<compile_context>
chip_gen: v6e
topology: v6e:2x2x1
jax: 0.10.0
libtpu: 0.0.40
codegen_flags: <defaults>
</compile_context>

<pallas_src>
import jax
import jax.numpy as jnp
from jax.experimental import pallas as pl
from jax.experimental.pallas import tpu as pltpu


LEAKY_SLOPE = 0.01  # nn.LeakyReLU default negative_slope


def _round_up(x, m):
    return ((x + m - 1) // m) * m


def make_textcnn_kernel(filter_sizes, seq_len, seq_len_pad, emb_dim, f_pad):
    """seq_len: original length (defines the valid conv rows); seq_len_pad:
    8-aligned length actually carried through the kernel."""
    kmax = max(filter_sizes)

    def kernel(ids_ref, table_ref, convw_ref, convb_ref, fcw_ref, fcb_ref,
               logits_ref):
        rows = ids_ref.shape[0]                     # tb * seq_len_pad (static)
        tb = rows // seq_len_pad

        # ---- nn.Embedding gather as a plain 2-D one-hot matmul on the MXU ----
        ids_col = ids_ref[...]                                    # (rows, 1)
        v_pad = table_ref.shape[0]
        vocab_iota = jax.lax.broadcasted_iota(jnp.int32, (rows, v_pad), 1)
        onehot = (vocab_iota == ids_col).astype(jnp.bfloat16)     # (rows, V_pad)
        # One-hot rows select single bf16 table entries -> result is exact.
        emb = jnp.dot(onehot, table_ref[...],
                      preferred_element_type=jnp.float32)         # (rows, E)

        # ---- all kmax shifted FULL-length windows -----------------------------
        # window_s[r] = emb[r + s]; rows that run past a sequence's end pick up
        # the next sequence / the zero tail, but they all land at positions
        # t >= lout and are masked to -inf before the max-pool below.
        if kmax > 1:
            emb_tail = jnp.concatenate(
                [emb, jnp.zeros((8, emb_dim), emb.dtype)], axis=0)
            windows = [emb] + [emb_tail[s:s + rows, :] for s in range(1, kmax)]
            unf = jnp.concatenate(windows, axis=1)                # (rows, kmax*E)
        else:
            unf = emb
        # Single bf16 cast of the matmul operand (merged branches -> one cast).
        unf = unf.astype(jnp.bfloat16)

        # ---- ONE merged conv matmul for every filter size ---------------------
        conv = jnp.dot(unf, convw_ref[...],
                       preferred_element_type=jnp.float32)        # (rows, n*F_pad)
        conv = conv + convb_ref[...]
        conv = jnp.where(conv >= 0, conv, LEAKY_SLOPE * conv)     # LeakyReLU

        # ---- per-branch tail mask + max-pool, then one merged FC matmul -------
        t_iota = jax.lax.broadcasted_iota(
            jnp.int32, (tb, seq_len_pad, f_pad), 1)
        pooled = []
        for i, k in enumerate(filter_sizes):
            lout = seq_len - k + 1                    # valid conv output rows
            ci = conv[:, i * f_pad:(i + 1) * f_pad]   # free 128-aligned slice
            ci = ci.reshape(tb, seq_len_pad, f_pad)   # clean (L_pad % 8 == 0)
            ci = jnp.where(t_iota < lout, ci, -jnp.inf)
            # Padded filter lanes stay exactly 0 after the max (zero weights and
            # bias, at least one unmasked row), so the zero fc rows keep them
            # inert.
            pooled.append(jnp.max(ci, axis=1))        # (tb, F_pad)

        feat = jnp.concatenate(pooled, axis=1).astype(jnp.bfloat16)  # (tb, n*F_pad)
        logits = fcb_ref[...] + jnp.dot(feat, fcw_ref[...],
                                        preferred_element_type=jnp.float32)
        logits_ref[...] = logits

    return kernel


def textcnn_forward(token_ids, params, filter_sizes, *, batch_tile=None):
    """token_ids: (B, L) int32. Returns (logits (B, C) f32, classes (B,) i32)."""
    filter_sizes = tuple(filter_sizes)
    n_sizes = len(filter_sizes)
    kmax = max(filter_sizes)

    emb_table = params["embedding"]                   # (V, E)
    V, E = emb_table.shape
    F = params[f"conv_b_{filter_sizes[0]}"].shape[0]
    C = params["fc_b"].shape[0]
    B, L = token_ids.shape
    assert kmax <= L, "filter size larger than sequence length"

    # ---- lane-dense padded layouts (zero padding never reaches valid lanes) --
    F_pad = _round_up(F, 128)
    C_pad = _round_up(C, 128)
    V_pad = _round_up(V, 128)
    L_pad = _round_up(L, 8)     # keeps the (rows -> (tb, L)) reshapes tile-clean

    table_p = jnp.zeros((V_pad, E), jnp.bfloat16).at[:V, :].set(
        emb_table.astype(jnp.bfloat16))

    # Merged conv weight: every filter size becomes 128 columns of one
    # (kmax*E, n*F_pad) bf16 matrix; missing shift rows and pad lanes are zero.
    convw = jnp.zeros((kmax * E, n_sizes * F_pad), jnp.bfloat16)
    convb = jnp.zeros((1, n_sizes * F_pad), jnp.float32)
    for i, k in enumerate(filter_sizes):
        w2d = params[f"conv_w_{k}"].reshape(F, k * E).T            # row s*E+e
        convw = convw.at[:k * E, i * F_pad:i * F_pad + F].set(
            w2d.astype(jnp.bfloat16))
        convb = convb.at[0, i * F_pad:i * F_pad + F].set(
            params[f"conv_b_{k}"].astype(jnp.float32))

    # Merged fc weight (bf16 operands, f32 accumulation in-kernel).
    fcw = jnp.zeros((n_sizes * F_pad, C_pad), jnp.bfloat16)
    for i in range(n_sizes):
        fcw = fcw.at[i * F_pad:i * F_pad + F, :C].set(
            params["fc_w"][:, i * F:(i + 1) * F].T.astype(jnp.bfloat16))
    fcb = jnp.zeros((1, C_pad), jnp.float32).at[0, :C].set(
        params["fc_b"].astype(jnp.float32))

    # ---- batch tiling: big tiles fill the MXU M dim (M = tb * L_pad); keep
    # >= 2 grid steps when the batch allows so the "parallel" axis can shard
    # across both TensorCores on v7x (single TC on v5e/v6e loses nothing).
    if batch_tile is None:
        tb = 8 if B <= 8 else min(128, _round_up((B + 1) // 2, 8))
    else:
        tb = _round_up(max(batch_tile, 8), 8)
    B_pad = _round_up(B, tb)

    ids = token_ids.astype(jnp.int32)
    if L_pad != L:
        ids = jnp.pad(ids, ((0, 0), (0, L_pad - L)))
    if B_pad != B:
        ids = jnp.pad(ids, ((0, B_pad - B), (0, 0)))
    # Flattened here so the kernel's one-hot -> table matmul is plain 2-D.
    ids_flat = ids.reshape(B_pad * L_pad, 1)

    rows = tb * L_pad
    kernel = make_textcnn_kernel(filter_sizes, L, L_pad, E, F_pad)
    logits_p = pl.pallas_call(
        kernel,
        out_shape=jax.ShapeDtypeStruct((B_pad, C_pad), jnp.float32),
        grid=(B_pad // tb,),
        in_specs=[
            pl.BlockSpec((rows, 1), lambda b: (b, 0)),
            pl.BlockSpec((V_pad, E), lambda b: (0, 0)),
            pl.BlockSpec((kmax * E, n_sizes * F_pad), lambda b: (0, 0)),
            pl.BlockSpec((1, n_sizes * F_pad), lambda b: (0, 0)),
            pl.BlockSpec((n_sizes * F_pad, C_pad), lambda b: (0, 0)),
            pl.BlockSpec((1, C_pad), lambda b: (0, 0)),
        ],
        out_specs=pl.BlockSpec((tb, C_pad), lambda b: (b, 0)),
        compiler_params=pltpu.CompilerParams(
            dimension_semantics=("parallel",),
            vmem_limit_bytes=32 * 1024 * 1024),
    )(ids_flat, table_p, convw, convb, fcw, fcb)

    logits = logits_p[:B, :C]
    # argmax(log_softmax(x)) == argmax(x): matches torch.max(probs, 1)[1].
    classes = jnp.argmax(logits, axis=1).astype(jnp.int32)
    return logits, classes


def init_params(key, vocab_size, filter_sizes, num_filters, embedding_dim,
                num_classes):
    """Deterministic synthetic parameters in the PyTorch module's native layouts."""
    params = {}
    keys = jax.random.split(key, 2 * len(filter_sizes) + 3)
    ki = iter(keys)
    params["embedding"] = jax.random.normal(
        next(ki), (vocab_size, embedding_dim), jnp.float32)
    for k in filter_sizes:
        params[f"conv_w_{k}"] = 0.1 * jax.random.normal(
            next(ki), (num_filters, 1, k, embedding_dim), jnp.float32)
        params[f"conv_b_{k}"] = 0.1 * jax.random.normal(
            next(ki), (num_filters,), jnp.float32)
    params["fc_w"] = 0.1 * jax.random.normal(
        next(ki), (num_classes, len(filter_sizes) * num_filters), jnp.float32)
    params["fc_b"] = 0.1 * jax.random.normal(
        next(ki), (num_classes,), jnp.float32)
    return params


if __name__ == "__main__":
    vocab_size = 50
    filter_sizes = (2, 3, 4)
    num_filters = 8
    embedding_dim = 32
    num_classes = 4
    batch = 16
    seq_len = 16

    key = jax.random.PRNGKey(0)
    pkey, xkey = jax.random.split(key)
    params = init_params(pkey, vocab_size, filter_sizes, num_filters,
                         embedding_dim, num_classes)
    token_ids = jax.random.randint(
        xkey, (batch, seq_len), 0, vocab_size, dtype=jnp.int32)

    # TODO(synk): nn.Dropout is instantiated but never applied in forward(),
    # so it is intentionally omitted here.
    logits, classes = textcnn_forward(token_ids, params, filter_sizes)
    jax.block_until_ready((logits, classes))

    # ---- pure-JAX reference of the same math (bf16 matmul operands, f32 acc) -
    table_r = params["embedding"].astype(jnp.bfloat16).astype(jnp.float32)
    emb_r = jnp.take(table_r, token_ids, axis=0)          # (B, L, E)
    feats = []
    for k in filter_sizes:
        w = params[f"conv_w_{k}"].astype(jnp.bfloat16).astype(jnp.float32)
        lout = seq_len - k + 1
        conv = jnp.zeros((batch, lout, num_filters), jnp.float32)
        for s in range(k):
            conv = conv + jnp.einsum(
                "ble,fe->blf", emb_r[:, s:s + lout, :], w[:, 0, s, :],
                precision=jax.lax.Precision.HIGHEST)
        conv = conv + params[f"conv_b_{k}"][None, None, :]
        conv = jnp.where(conv >= 0, conv, LEAKY_SLOPE * conv)
        feats.append(jnp.max(conv, axis=1))
    feat = jnp.concatenate(feats, axis=1)                 # (B, n*F)
    feat_bf = feat.astype(jnp.bfloat16).astype(jnp.float32)
    fcw_bf = params["fc_w"].astype(jnp.bfloat16).astype(jnp.float32)
    ref_logits = jnp.dot(feat_bf, fcw_bf.T,
                         precision=jax.lax.Precision.HIGHEST) \
        + params["fc_b"][None, :]
    ref_classes = jnp.argmax(ref_logits, axis=1).astype(jnp.int32)

    assert logits.shape == (batch, num_classes)
    assert jnp.allclose(logits, ref_logits, atol=2e-3, rtol=2e-3), (
        float(jnp.max(jnp.abs(logits - ref_logits))))
    assert jnp.array_equal(classes, ref_classes)
    print("KERNEL_OK")
</pallas_src>

<mosaic_0001>
module attributes {stable_mosaic.version = 11 : i64} {
  func.func @kernel(%arg0: i32, %arg1: memref<128x1xi32, #tpu.memory_space<vmem>>, %arg2: memref<128x32xbf16, #tpu.memory_space<vmem>>, %arg3: memref<128x384xbf16, #tpu.memory_space<vmem>>, %arg4: memref<1x384xf32, #tpu.memory_space<vmem>>, %arg5: memref<384x128xbf16, #tpu.memory_space<vmem>>, %arg6: memref<1x128xf32, #tpu.memory_space<vmem>>, %arg7: memref<8x128xf32, #tpu.memory_space<vmem>>) attributes {dimension_semantics = [#tpu.dimension_semantics<parallel>], iteration_bounds = array<i64: 2>, scalar_prefetch = 0 : i64, scratch_operands = 0 : i64, tpu.core_type = #tpu.core_type<tc>, window_params = [{transform_indices = @transform_0, window_bounds = array<i64: 128, 1>}, {pipeline_mode = #tpu.pipeline_mode<synchronous>, transform_indices = @transform_1, window_bounds = array<i64: 128, 32>}, {pipeline_mode = #tpu.pipeline_mode<synchronous>, transform_indices = @transform_2, window_bounds = array<i64: 128, 384>}, {pipeline_mode = #tpu.pipeline_mode<synchronous>, transform_indices = @transform_3, window_bounds = array<i64: 1, 384>}, {pipeline_mode = #tpu.pipeline_mode<synchronous>, transform_indices = @transform_4, window_bounds = array<i64: 384, 128>}, {pipeline_mode = #tpu.pipeline_mode<synchronous>, transform_indices = @transform_5, window_bounds = array<i64: 1, 128>}, {transform_indices = @transform_6, window_bounds = array<i64: 8, 128>}]} {
    %c0 = arith.constant 0 : index
    %c0_0 = arith.constant 0 : index
    %0 = vector.load %arg1[%c0, %c0_0] : memref<128x1xi32, #tpu.memory_space<vmem>>, vector<128x1xi32>
    %1 = tpu.iota {dimensions = array<i32: 1>} : vector<128x128xi32>
    %2 = vector.broadcast %0 : vector<128x1xi32> to vector<128x128xi32>
    %3 = arith.cmpi eq, %1, %2 : vector<128x128xi32>
    %4 = arith.extui %3 : vector<128x128xi1> to vector<128x128xi32>
    %5 = arith.sitofp %4 : vector<128x128xi32> to vector<128x128xf32>
    %6 = arith.truncf %5 : vector<128x128xf32> to vector<128x128xbf16>
    %c0_1 = arith.constant 0 : index
    %c0_2 = arith.constant 0 : index
    %7 = vector.load %arg2[%c0_1, %c0_2] : memref<128x32xbf16, #tpu.memory_space<vmem>>, vector<128x32xbf16>
    %cst = arith.constant dense<0.000000e+00> : vector<128x32xf32>
    %8 = tpu.matmul %6, %7, %cst {dimension_numbers = #tpu.dot_dimension_numbers<[1], [0], [0], [1], [0, 0, 1, 1], [], []>} : vector<128x128xbf16>, vector<128x32xbf16>, vector<128x32xf32> -> vector<128x32xf32>
    %cst_3 = arith.constant 0.000000e+00 : f32
    %9 = vector.broadcast %cst_3 : f32 to vector<8x32xf32>
    %10 = tpu.concatenate %8, %9 in 0 : vector<128x32xf32>, vector<8x32xf32> -> vector<136x32xf32>
    %11 = vector.extract_strided_slice %10 {offsets = [1, 0], sizes = [128, 32], strides = [1, 1]} : vector<136x32xf32> to vector<128x32xf32>
    %12 = vector.extract_strided_slice %10 {offsets = [2, 0], sizes = [128, 32], strides = [1, 1]} : vector<136x32xf32> to vector<128x32xf32>
    %13 = vector.extract_strided_slice %10 {offsets = [3, 0], sizes = [128, 32], strides = [1, 1]} : vector<136x32xf32> to vector<128x32xf32>
    %14 = tpu.concatenate %8, %11, %12, %13 in 1 : vector<128x32xf32>, vector<128x32xf32>, vector<128x32xf32>, vector<128x32xf32> -> vector<128x128xf32>
    %15 = arith.truncf %14 : vector<128x128xf32> to vector<128x128xbf16>
    %c0_4 = arith.constant 0 : index
    %c0_5 = arith.constant 0 : index
    %16 = vector.load %arg3[%c0_4, %c0_5] : memref<128x384xbf16, #tpu.memory_space<vmem>>, vector<128x384xbf16>
    %cst_6 = arith.constant dense<0.000000e+00> : vector<128x384xf32>
    %17 = tpu.matmul %15, %16, %cst_6 {dimension_numbers = #tpu.dot_dimension_numbers<[1], [0], [0], [1], [0, 0, 1, 1], [], []>} : vector<128x128xbf16>, vector<128x384xbf16>, vector<128x384xf32> -> vector<128x384xf32>
    %c0_7 = arith.constant 0 : index
    %c0_8 = arith.constant 0 : index
    %18 = vector.load %arg4[%c0_7, %c0_8] : memref<1x384xf32, #tpu.memory_space<vmem>>, vector<1x384xf32>
    %19 = vector.broadcast %18 : vector<1x384xf32> to vector<128x384xf32>
    %20 = arith.addf %17, %19 : vector<128x384xf32>
    %cst_9 = arith.constant 0.000000e+00 : f32
    %21 = vector.broadcast %cst_9 : f32 to vector<128x384xf32>
    %22 = arith.cmpf oge, %20, %21 : vector<128x384xf32>
    %cst_10 = arith.constant 0.00999999977 : f32
    %23 = vector.broadcast %cst_10 : f32 to vector<128x384xf32>
    %24 = arith.mulf %23, %20 : vector<128x384xf32>
    %25 = arith.select %22, %20, %24 : vector<128x384xi1>, vector<128x384xf32>
    %26 = tpu.iota {dimensions = array<i32: 1>} : vector<8x16x128xi32>
    %27 = vector.extract_strided_slice %25 {offsets = [0, 0], sizes = [128, 128], strides = [1, 1]} : vector<128x384xf32> to vector<128x128xf32>
    %28 = vector.shape_cast %27 : vector<128x128xf32> to vector<8x16x128xf32>
    %c15_i32 = arith.constant 15 : i32
    %29 = vector.broadcast %c15_i32 : i32 to vector<8x16x128xi32>
    %30 = arith.cmpi slt, %26, %29 : vector<8x16x128xi32>
    %cst_11 = arith.constant 0xFF800000 : f32
    %31 = vector.broadcast %cst_11 : f32 to vector<8x16x128xf32>
    %32 = arith.select %30, %28, %31 : vector<8x16x128xi1>, vector<8x16x128xf32>
    %cst_12 = arith.constant dense<0xFF800000> : vector<8x128xf32>
    %33 = vector.multi_reduction <maximumf>, %32, %cst_12 [1] : vector<8x16x128xf32> to vector<8x128xf32>
    %34 = vector.extract_strided_slice %25 {offsets = [0, 128], sizes = [128, 128], strides = [1, 1]} : vector<128x384xf32> to vector<128x128xf32>
    %35 = vector.shape_cast %34 : vector<128x128xf32> to vector<8x16x128xf32>
    %c14_i32 = arith.constant 14 : i32
    %36 = vector.broadcast %c14_i32 : i32 to vector<8x16x128xi32>
    %37 = arith.cmpi slt, %26, %36 : vector<8x16x128xi32>
    %cst_13 = arith.constant 0xFF800000 : f32
    %38 = vector.broadcast %cst_13 : f32 to vector<8x16x128xf32>
    %39 = arith.select %37, %35, %38 : vector<8x16x128xi1>, vector<8x16x128xf32>
    %cst_14 = arith.constant dense<0xFF800000> : vector<8x128xf32>
    %40 = vector.multi_reduction <maximumf>, %39, %cst_14 [1] : vector<8x16x128xf32> to vector<8x128xf32>
    %41 = vector.extract_strided_slice %25 {offsets = [0, 256], sizes = [128, 128], strides = [1, 1]} : vector<128x384xf32> to vector<128x128xf32>
    %42 = vector.shape_cast %41 : vector<128x128xf32> to vector<8x16x128xf32>
    %c13_i32 = arith.constant 13 : i32
    %43 = vector.broadcast %c13_i32 : i32 to vector<8x16x128xi32>
    %44 = arith.cmpi slt, %26, %43 : vector<8x16x128xi32>
    %cst_15 = arith.constant 0xFF800000 : f32
    %45 = vector.broadcast %cst_15 : f32 to vector<8x16x128xf32>
    %46 = arith.select %44, %42, %45 : vector<8x16x128xi1>, vector<8x16x128xf32>
    %cst_16 = arith.constant dense<0xFF800000> : vector<8x128xf32>
    %47 = vector.multi_reduction <maximumf>, %46, %cst_16 [1] : vector<8x16x128xf32> to vector<8x128xf32>
    %48 = tpu.concatenate %33, %40, %47 in 1 : vector<8x128xf32>, vector<8x128xf32>, vector<8x128xf32> -> vector<8x384xf32>
    %49 = arith.truncf %48 : vector<8x384xf32> to vector<8x384xbf16>
    %c0_17 = arith.constant 0 : index
    %c0_18 = arith.constant 0 : index
    %50 = vector.load %arg6[%c0_17, %c0_18] : memref<1x128xf32, #tpu.memory_space<vmem>>, vector<1x128xf32>
    %c0_19 = arith.constant 0 : index
    %c0_20 = arith.constant 0 : index
    %51 = vector.load %arg5[%c0_19, %c0_20] : memref<384x128xbf16, #tpu.memory_space<vmem>>, vector<384x128xbf16>
    %cst_21 = arith.constant dense<0.000000e+00> : vector<8x128xf32>
    %52 = tpu.matmul %49, %51, %cst_21 {dimension_numbers = #tpu.dot_dimension_numbers<[1], [0], [0], [1], [0, 0, 1, 1], [], []>} : vector<8x384xbf16>, vector<384x128xbf16>, vector<8x128xf32> -> vector<8x128xf32>
    %53 = vector.broadcast %50 : vector<1x128xf32> to vector<8x128xf32>
    %54 = arith.addf %53, %52 : vector<8x128xf32>
    %c0_22 = arith.constant 0 : index
    %c0_23 = arith.constant 0 : index
    %55 = vector.load %arg7[%c0_22, %c0_23] : memref<8x128xf32, #tpu.memory_space<vmem>>, vector<8x128xf32>
    tpu.vector_store %arg7[%c0_22, %c0_23], %54 {strides = array<i32>} : memref<8x128xf32, #tpu.memory_space<vmem>>, vector<8x128xf32>,
    return
  }
  func.func @transform_0(%arg0: i32) -> (i32, i32) {
    %c0_i32 = arith.constant 0 : i32
    %c0_i32_0 = arith.constant 0 : i32
    return %arg0, %c0_i32 : i32, i32
  }
  func.func @transform_1(%arg0: i32) -> (i32, i32) {
    %c0_i32 = arith.constant 0 : i32
    %c0_i32_0 = arith.constant 0 : i32
    %c0_i32_1 = arith.constant 0 : i32
    return %c0_i32, %c0_i32_0 : i32, i32
  }
  func.func @transform_2(%arg0: i32) -> (i32, i32) {
    %c0_i32 = arith.constant 0 : i32
    %c0_i32_0 = arith.constant 0 : i32
    %c0_i32_1 = arith.constant 0 : i32
    return %c0_i32, %c0_i32_0 : i32, i32
  }
  func.func @transform_3(%arg0: i32) -> (i32, i32) {
    %c0_i32 = arith.constant 0 : i32
    %c0_i32_0 = arith.constant 0 : i32
    %c0_i32_1 = arith.constant 0 : i32
    return %c0_i32, %c0_i32_0 : i32, i32
  }
  func.func @transform_4(%arg0: i32) -> (i32, i32) {
    %c0_i32 = arith.constant 0 : i32
    %c0_i32_0 = arith.constant 0 : i32
    %c0_i32_1 = arith.constant 0 : i32
    return %c0_i32, %c0_i32_0 : i32, i32
  }
  func.func @transform_5(%arg0: i32) -> (i32, i32) {
    %c0_i32 = arith.constant 0 : i32
    %c0_i32_0 = arith.constant 0 : i32
    %c0_i32_1 = arith.constant 0 : i32
    return %c0_i32, %c0_i32_0 : i32, i32
  }
  func.func @transform_6(%arg0: i32) -> (i32, i32) {
    %c0_i32 = arith.constant 0 : i32
    %c0_i32_0 = arith.constant 0 : i32
    return %arg0, %c0_i32 : i32, i32
  }
}

</mosaic_0001>

<bundles_post_ra>
// kernel: tpu_custom_call.1
= control target key start
LH: loop header
LB: loop body
LE: loop exit
PB: predicated region body
PF: predicated region fallthrough
CT: control target
= control target key end

     0   :  { %11 = vsyncpa [#allocation3], 0  ;;  %s3385_s0 = inlined_call_operand.vmem [shape: s32[256,1], index: 0, kind: input, shape index: {}]   ;;  %s3386_s1 = inlined_call_operand.vmem [shape: bf16[128,32], index: 1, kind: input, shape index: {}]   ;;  %s3387_s2 = inlined_call_operand.vmem [shape: bf16[128,384], index: 2, kind: input, shape index: {}]   ;;  %s3388_s3 = inlined_call_operand.vmem [shape: f32[1,384], index: 3, kind: input, shape index: {}]   ;;  %s3389_s4 = inlined_call_operand.hbm [shape: bf16[384,128], index: 4, kind: input, shape index: {}]   ;;  %s3390_s5 = inlined_call_operand.vmem [shape: f32[1,128], index: 5, kind: input, shape index: {}]   ;;  %s3391_s6 = inlined_call_operand.hbm [shape: f32[16,128], index: 6, kind: output, shape index: {}]  }
   0x1   :  { %12 = vsyncpa [#allocation4], 0 }
   0x2   :  { %14 = vsyncpa [#allocation4 + $0x1], 0  ;;  %s2685_s21 = smov 0   ;;  %s2687_s22 = smov 0  }
   0x3   :  { %s2689_s23 = smov 0   ;;  %s2691_s24 = smov 0  }
   0x4 LB: > { %s2706_s25 = sadd.s32 4294967295, %s2637_s24   ;;  %s2053_s26 = sadd.s32 4294967294, %s2637_s24   ;;  %s2637_s24 = sphi %s2691_s24, %s3399_s24   ;;  %s2633_s23 = sphi %s2689_s23, %s3398_s23   ;;  %s2629_s22 = sphi %s2687_s22, %s3397_s22   ;;  %s2625_s21 = sphi %s2685_s21, %s3396_s21  }
   0x5   : > { %s2710_s27 = sadd.s32 1, %s2637_s24   ;;  %s158_s28 = sadd.s32 1, %s2633_s23 }
   0x6   : > { %s155_s29 = ssub.s32 %s2637_s24, %s2710_s27  ;;  %p168_p0 = scmp.ne.s32.totalorder %s2633_s23, %s2629_s22 }
   0x7   : > { %p156_p1 = scmp.eq.s32.totalorder %s155_s29, 0  ;;  %p169_p2 = scmp.eq.s32.totalorder %s2706_s25, 1 }
   0x8   : > { %p174_p3 = scmp.ne.s32.totalorder %s2629_s22, %s2625_s21  ;;  %p175_p4 = scmp.eq.s32.totalorder %s2053_s26, 1 }
   0x9   : > { %s2721_s30 = scalar_select %p156_p1, %s2633_s23, %s158_s28  }
   0xa   : > { %p2723_p5 = por %p169_p2, %p168_p0  ;;  %p2727_p6 = por %p175_p4, %p174_p3 }
   0xb   : > { %p2054_p7 = scmp.ge.s32.totalorder %s2637_s24, 1  ;;  %p182_p8 = scmp.lt.s32.totalorder %s2637_s24, 3 }
   0xc   : > { %s3393_s8 = scalar_select %p2727_p6, 1, 0 }
   0xd   : > { %p2316_p9 = scmp.eq.s32.totalorder %s2706_s25, 0  ;;  %p2734_p10 = pnand %p2054_p7, %p182_p8 }
   0xe   : > { %s2639_s10 = smov [#allocation2]  }
   0xf   : > { %s203_s11 = sshll.u32 %s2639_s10, 4  ;;  %p2308_p11 = pneg %p2734_p10  ;;  %s204_s11 = int_to_ptr.vmem [resolvable:$true] %s203_s11 }
  0x10   : > { %s2558_s12 = scalar_lea.vmem %s204_s11, 3072  ;;  %p2566_p3 = scmp.lt.s32.totalorder %s204_s11, %s204_s11 }
  0x11   : > { %p2309_p12 = pnand %p2316_p9, %p2308_p11  ;;  %p2559_p0 = scmp.ne.s32.totalorder %s204_s11, %s2558_s12 }
  0x12   : > { %p2567_p4 = scmp.lt.s32.totalorder %s2558_s12, %s2558_s12 }
  0x13   : > { %p2549_p13 = pneg %p2309_p12 }
  0x14   : > { %p2568_p6 = por %p2567_p4, %p2566_p3 }
  0x15   : > { %p2561_p1 = pnand %p2559_p0, %p2549_p13 }
  0x17   : > { %p2562_p2 = pneg %p2561_p1 }
  0x19   : > { %p2569_p7 = pnand %p2568_p6, %p2562_p2 }
  0x1b   : > { %2572 = shalt.err (!%p2569_p7)
}
  0x1c   : > { %s2640_s13 = smov 64   ;;  %s2641_s14 = smov 4  }
  0x1d   : > { %2311 = dma.hbm_to_vmem [thread:$0]  (!%p2309_p12), %s3389_s4, 3072, %s204_s11, [#allocation3], %s2640_s13, %s2640_s13, %s2641_s14  }
  0x1e   : > { %231 = sbr.rel (%p2734_p10) target bundleno = 1023 (0x3ff), region = 44 }
  0x23   : > { %2616 = dma.done.wait (%p2316_p9), [#allocation3], 3072  }
  0x24   : > { %2618 = vsyncadd (%p2316_p9), [#allocation3], 4294964224  ;;  %s2060_s17 = sshll.u32 %s2706_s25, 4  ;;  %v2642_v0 = vmov 0   ;;  %v2483_v7 = vld [vmem:[%s3386_s1 + $0x38] sm:$0xff]   ;;  %v2484_v8 = vld [vmem:[%s3386_s1 + $0x30] sm:$0xff]   ;;  %v284_v25 = vlaneseq }
  0x25   : > { %2362 = vset.pattern.permute.xlu1 %v2642_v0  ;;  %2361 = vset.pattern.permute.xlu0 %v2642_v0  ;;  %p262_p6 = scmp.lt.s32.totalorder %s2060_s17, 31  ;;  %v2485_v11 = vld [vmem:[%s3386_s1 + $0x28] sm:$0xff]   ;;  %v2486_v14 = vld [vmem:[%s3386_s1 + $0x20] sm:$0xff]   ;;  %v2487_v17 = vld [vmem:[%s3386_s1 + $0x18] sm:$0xff]   ;;  %v2643_v31 = vmov 1.0|1.0  }
  0x26   : > { %1082 = vmatprep.mubr.bf16.mxu1 %v2642_v0  ;;  %2218 = vmatprep.subr.bf16.mxu0 %v2483_v7  ;;  %v2488_v20 = vld [vmem:[%s3386_s1 + $0x10] sm:$0xff]   ;;  %v2489_v23 = vld [vmem:[%s3386_s1 + $0x8] sm:$0xff]   ;;  %v2490_v24 = vld [vmem:[%s3386_s1] sm:$0xff]   ;;  %v285_v28 = vand.u32 127, %v284_v25  ;;  %s2645_s11 = smov 64   ;;  %s2646_s12 = smov 32  }
  0x27   : > { %s3401_s17 = smov (!%p262_p6, %s2060_s17), 31  ;;  %2219 = vmatpush3.bf16.msra.mxu0 %v2483_v7  ;;  %v2491_v44 = vld [vmem:[%s3387_s2 + $0xac] ss:$12 sps:$4 sm:$0xff]   ;;  %v2493_v45 = vld [vmem:[%s3387_s2 + $0xa8] ss:$12 sps:$4 sm:$0xff]   ;;  %s2647_s13 = smov 96  }
  0x28   : > { %s2061_s18 = sshll.u32 %s3401_s17, 3  ;;  %2220 = vmatprep.subr.bf16.mxu0 %v2484_v8  ;;  %v2494_v46 = vld [vmem:[%s3387_s2 + $0x94] ss:$12 sps:$4 sm:$0xff]   ;;  %v2497_v47 = vld [vmem:[%s3387_s2 + $0xb0] ss:$12 sps:$4 sm:$0xff]   ;;  %1050 = vmatprep.subr.bf16.mxu1 %v2491_v44  ;;  %s258_s16 = sand.u32 1, %s2629_s22  }
  0x29   : > { %s2758_s26 = scalar_lea.vmem %s3385_s0, %s2061_s18  ;;  %v2501_v48 = vld [vmem:[%s3387_s2 + $0x98] ss:$12 sps:$4 sm:$0xff]   ;;  %1051 = vmatpush1.bf16.msra.mxu1 %v2493_v45  ;;  %v2496_v49 = vld [vmem:[%s3387_s2 + $0x90] ss:$12 sps:$4 sm:$0xff]   ;;  %v2505_v51 = vld [vmem:[%s3387_s2 + $0x80] ss:$12 sps:$4 sm:$0xff]  }
  0x2a   : > { %v270_v1 = vld [vmem:[%s2758_s26 + $0x10] sm:$0xff]  ;;  %v268_v2 = vld [vmem:[%s2758_s26] sm:$0xff]  ;;  %v271_v3 = vld [vmem:[%s2758_s26 + $0x18] sm:$0xff]  ;;  %1052 = vmatprep.subr.bf16.mxu1 %v2494_v46  ;;  %s2059_s17 = sshll.u32 %s258_s16, 3  ;;  %s2152_s20 = sshll.u32 %s2706_s25, 7 }
  0x2b   : > { %293 = vperm.xlu1 %2362, %v270_v1   ;;  %287 = vperm.xlu0 %2361, %v268_v2   ;;  %v269_v4 = vld [vmem:[%s2758_s26 + $0x8] sm:$0xff]  ;;  %v272_v6 = vld [vmem:[%s2758_s26 + $0x20] sm:$0xff]  ;;  %v275_v9 = vld [vmem:[%s2758_s26 + $0x38] sm:$0xff]  ;;  %s260_s28 = scalar_lea.vmem [#allocation5], %s2059_s17  ;;  %s1980_s10 = scalar_lea.hbm %s3391_s6, %s2152_s20 }
  0x2c   : > { %v273_v5 = vld [vmem:[%s2758_s26 + $0x28] sm:$0xff]  ;;  %v274_v10 = vld [vmem:[%s2758_s26 + $0x30] sm:$0xff]  ;;  %v276_v13 = vld [vmem:[%s2758_s26 + $0x40] sm:$0xff]  ;;  %2221 = vmatpush3.bf16.msra.mxu0 %v2484_v8  ;;  %s1982_s29 = sshll.u32 %s260_s28, 4  ;;  %s1983_s29 = int_to_ptr.vmem [resolvable:$true] %s1982_s29 }
  0x2d   : > { %v277_v12 = vld [vmem:[%s2758_s26 + $0x48] sm:$0xff]  ;;  %2222 = vmatprep.subr.bf16.mxu0 %v2485_v11  ;;  %v279_v15 = vld [vmem:[%s2758_s26 + $0x58] sm:$0xff]  ;;  %v278_v16 = vld [vmem:[%s2758_s26 + $0x50] sm:$0xff]  ;;  %1053 = vmatpush1.bf16.msra.mxu1 %v2496_v49 }
  0x2e   : > { %v281_v18 = vld [vmem:[%s2758_s26 + $0x68] sm:$0xff]  ;;  %v280_v19 = vld [vmem:[%s2758_s26 + $0x60] sm:$0xff]  ;;  %v283_v21 = vld [vmem:[%s2758_s26 + $0x78] sm:$0xff] }
  0x2f   : > { %296 = vperm.xlu1 %2362, %v271_v3   ;;  %290 = vperm.xlu0 %2361, %v269_v4   ;;  %v282_v22 = vld [vmem:[%s2758_s26 + $0x70] sm:$0xff]  ;;  %v2498_v50 = vld [vmem:[%s3387_s2 + $0x7c] ss:$12 sps:$4 sm:$0xff]   ;;  %v2500_v52 = vld [vmem:[%s3387_s2 + $0x78] ss:$12 sps:$4 sm:$0xff]  }
  0x30   : > { %2223 = vmatpush3.bf16.msra.mxu0 %v2485_v11  ;;  %1054 = vmatprep.subr.bf16.mxu1 %v2498_v50  ;;  %v2502_v53 = vld [vmem:[%s3387_s2 + $0x64] ss:$12 sps:$4 sm:$0xff]   ;;  %v2509_v54 = vld [vmem:[%s3387_s2 + $0x68] ss:$12 sps:$4 sm:$0xff]   ;;  %v2504_v55 = vld [vmem:[%s3387_s2 + $0x60] ss:$12 sps:$4 sm:$0xff]  }
  0x31   : > { %2224 = vmatprep.subr.bf16.mxu0 %v2486_v14  ;;  %1055 = vmatpush1.bf16.msra.mxu1 %v2500_v52  ;;  %v2506_v56 = vld [vmem:[%s3387_s2 + $0x4c] ss:$12 sps:$4 sm:$0xff]   ;;  %v2513_v57 = vld [vmem:[%s3387_s2 + $0x50] ss:$12 sps:$4 sm:$0xff]   ;;  %v2508_v58 = vld [vmem:[%s3387_s2 + $0x48] ss:$12 sps:$4 sm:$0xff]  }
  0x32   : > { %1056 = vmatprep.subr.bf16.mxu1 %v2502_v53  ;;  %v2510_v59 = vld [vmem:[%s3387_s2 + $0x34] ss:$12 sps:$4 sm:$0xff]   ;;  %v2512_v60 = vld [vmem:[%s3387_s2 + $0x30] ss:$12 sps:$4 sm:$0xff]   ;;  %v2516_v2 = vld [vmem:[%s3387_s2 + $0x18] ss:$12 sps:$4 sm:$0xff]  }
  0x33   : > { %302 = vperm.xlu1 %2362, %v273_v5   ;;  %299 = vperm.xlu0 %2361, %v272_v6   ;;  %v2514_v63 = vld [vmem:[%s3387_s2 + $0x1c] ss:$12 sps:$4 sm:$0xff]   ;;  %v2517_v3 = vld [vmem:[%s3387_s2 + $0x38] ss:$12 sps:$4 sm:$0xff]   ;;  %v2520_v6 = vld [vmem:[%s3387_s2] ss:$12 sps:$4 sm:$0xff]  }
  0x34   : > { %2225 = vmatpush3.bf16.msra.mxu0 %v2486_v14  ;;  %v2518_v5 = vld [vmem:[%s3387_s2 + $0x4] ss:$12 sps:$4 sm:$0xff]   ;;  %v2521_v7 = vld [vmem:[%s3387_s2 + $0x20] ss:$12 sps:$4 sm:$0xff]  }
  0x35   : > { %2226 = vmatprep.subr.bf16.mxu0 %v2487_v17  ;;  %1057 = vmatpush1.bf16.msra.mxu1 %v2504_v55 }
  0x36   : > { %1058 = vmatprep.subr.bf16.mxu1 %v2506_v56 }
  0x37   : > { %308 = vperm.xlu1 %2362, %v275_v9   ;;  %305 = vperm.xlu0 %2361, %v274_v10  }
  0x38   : > { %2227 = vmatpush3.bf16.msra.mxu0 %v2487_v17 }
  0x39   : > { %2228 = vmatprep.subr.bf16.mxu0 %v2488_v20  ;;  %1059 = vmatpush1.bf16.msra.mxu1 %v2508_v58 }
  0x3a   : > { %1060 = vmatprep.subr.bf16.mxu1 %v2510_v59 }
  0x3b   : > { %314 = vperm.xlu1 %2362, %v277_v12   ;;  %311 = vperm.xlu0 %2361, %v276_v13  }
  0x3c   : > { %2229 = vmatpush3.bf16.msra.mxu0 %v2488_v20 }
  0x3d   : > { %2230 = vmatprep.subr.bf16.mxu0 %v2489_v23  ;;  %1061 = vmatpush1.bf16.msra.mxu1 %v2512_v60 }
  0x3e   : > { %1062 = vmatprep.subr.bf16.mxu1 %v2514_v63 }
  0x3f   : > { %320 = vperm.xlu1 %2362, %v279_v15   ;;  %317 = vperm.xlu0 %2361, %v278_v16  }
  0x40   : > { %2231 = vmatpush3.bf16.msra.mxu0 %v2489_v23 }
  0x41   : > { %2232 = vmatprep.subr.bf16.mxu0 %v2490_v24  ;;  %1063 = vmatpush1.bf16.msra.mxu1 %v2516_v2 }
  0x42   : > { %1064 = vmatprep.subr.bf16.mxu1 %v2518_v5 }
  0x43   : > { %326 = vperm.xlu1 %2362, %v281_v18   ;;  %323 = vperm.xlu0 %2361, %v280_v19  }
  0x44   : > { %2233 = vmatpush3.bf16.msra.mxu0 %v2490_v24 }
  0x45   : > { %2250 = vmatprep.subr.bf16.mxu0 %v2497_v47  ;;  %1065 = vmatpush1.bf16.msra.mxu1 %v2520_v6 }
  0x47   : > { %332 = vperm.xlu1 %2362, %v283_v21   ;;  %329 = vperm.xlu0 %2361, %v282_v22  }
  0xa6   : > { %v294_v26 = vpop.permute.xlu1 %293  ;;  %v288_v27 = vpop.permute.xlu0 %287 }
  0xa7   : > { %vm336_vm0 = vcmp.eq.s32.totalorder %v285_v28, %v294_v26  ;;  %vm334_vm3 = vcmp.eq.s32.totalorder %v285_v28, %v288_v27  ;;  %v2644_v27 = vmov 0.0  }
  0xa8   : > { %2282 = vmatprep.subr.bf16.mxu1 %v2644_v27 }
  0xaa   : > { %v297_v29 = vpop.permute.xlu1 %296  ;;  %v291_v30 = vpop.permute.xlu0 %290 }
  0xab   : > { %vm337_vm1 = vcmp.eq.s32.totalorder %v285_v28, %v297_v29  ;;  %vm335_vm2 = vcmp.eq.s32.totalorder %v285_v28, %v291_v30 }
  0xac   : > { %vm2088_vm4 = vmpackc.low %vm337_vm1, %vm336_vm0 }
  0xad   : > { %vm2086_vm5 = vmpackc.low %vm335_vm2, %vm334_vm3 }
  0xae   : > { %2234 = vmatprep.mubr.msk.bf16.mxu0 %vm2086_vm5, %v2643_v31  ;;  %v303_v32 = vpop.permute.xlu1 %302  ;;  %v300_v33 = vpop.permute.xlu0 %299 }
  0xaf   : > { %vm339_vm6 = vcmp.eq.s32.totalorder %v285_v28, %v303_v32  ;;  %2235 = vmatmul.mubr.msk.bf16.vlgmr.msra.gmra.mxu0 %vm2088_vm4, %v2643_v31  ;;  %vm338_vm7 = vcmp.eq.s32.totalorder %v285_v28, %v300_v33 }
  0xb0   : > { %vm2090_vm8 = vmpackc.low %vm339_vm6, %vm338_vm7  ;;  %2251 = vmatpush3.bf16.msra.mxu0 %v2497_v47 }
  0xb1   : > { %2238 = vmatprep.mubr.msk.bf16.mxu0 %vm2090_vm8, %v2643_v31  ;;  %2252 = vmatprep.subr.bf16.mxu0 %v2501_v48  ;;  %vm650_vm8 = vcmask 1045504  }
  0xb2   : > { %v309_v34 = vpop.permute.xlu1 %308  ;;  %v306_v35 = vpop.permute.xlu0 %305 }
  0xb3   : > { %vm341_vm9 = vcmp.eq.s32.totalorder %v285_v28, %v309_v34  ;;  %vm340_vm10 = vcmp.eq.s32.totalorder %v285_v28, %v306_v35 }
  0xb4   : > { %vm2092_vm11 = vmpackc.low %vm341_vm9, %vm340_vm10  ;;  %2253 = vmatpush3.bf16.msra.mxu0 %v2501_v48  ;;  %vm568_vm9 = vcmask 1046528   ;;  %vm732_vm10 = vcmask 1044480  }
  0xb5   : > { %2254 = vmatprep.subr.bf16.mxu0 %v2505_v51 }
  0xb6   : > { %v315_v36 = vpop.permute.xlu1 %314  ;;  %v312_v37 = vpop.permute.xlu0 %311 }
  0xb7   : > { %vm343_vm12 = vcmp.eq.s32.totalorder %v285_v28, %v315_v36  ;;  %2239 = vmatmul.mubr.msk.bf16.gmra.mxu0 %vm2092_vm11, %v2643_v31  ;;  %vm342_vm13 = vcmp.eq.s32.totalorder %v285_v28, %v312_v37  ;;  %vm814_vm11 = vcmask 261120  }
  0xb8   : > { %vm2094_vm14 = vmpackc.low %vm343_vm12, %vm342_vm13  ;;  %2255 = vmatpush3.bf16.msra.mxu0 %v2505_v51  ;;  %vm831_vm12 = vcmask 523264   ;;  %vm848_vm13 = vcmask 785408  }
  0xb9   : > { %2242 = vmatprep.mubr.msk.bf16.mxu0 %vm2094_vm14, %v2643_v31  ;;  %2256 = vmatprep.subr.bf16.mxu0 %v2509_v54  ;;  %vm2648_vm14 = vmmov 0  }
  0xba   : > { %v321_v38 = vpop.permute.xlu1 %320  ;;  %v318_v39 = vpop.permute.xlu0 %317 }
  0xbb   : > { %vm345_vm15 = vcmp.eq.s32.totalorder %v285_v28, %v321_v38  ;;  %vm344_vm0 = vcmp.eq.s32.totalorder %v285_v28, %v318_v39 }
  0xbc   : > { %vm2096_vm1 = vmpackc.low %vm345_vm15, %vm344_vm0  ;;  %2257 = vmatpush3.bf16.msra.mxu0 %v2509_v54 }
  0xbd   : > { %2258 = vmatprep.subr.bf16.mxu0 %v2513_v57 }
  0xbe   : > { %v327_v40 = vpop.permute.xlu1 %326  ;;  %v324_v41 = vpop.permute.xlu0 %323 }
  0xbf   : > { %vm347_vm2 = vcmp.eq.s32.totalorder %v285_v28, %v327_v40  ;;  %2243 = vmatmul.mubr.msk.bf16.gmra.mxu0 %vm2096_vm1, %v2643_v31  ;;  %vm346_vm3 = vcmp.eq.s32.totalorder %v285_v28, %v324_v41 }
  0xc0   : > { %vm2098_vm4 = vmpackc.low %vm347_vm2, %vm346_vm3  ;;  %2259 = vmatpush3.bf16.msra.mxu0 %v2513_v57 }
  0xc1   : > { %2246 = vmatprep.mubr.msk.bf16.mxu0 %vm2098_vm4, %v2643_v31  ;;  %2260 = vmatprep.subr.bf16.mxu0 %v2517_v3 }
  0xc2   : > { %v333_v42 = vpop.permute.xlu1 %332  ;;  %v330_v43 = vpop.permute.xlu0 %329 }
  0xc3   : > { %vm349_vm5 = vcmp.eq.s32.totalorder %v285_v28, %v333_v42  ;;  %vm348_vm6 = vcmp.eq.s32.totalorder %v285_v28, %v330_v43 }
  0xc4   : > { %vm2100_vm7 = vmpackc.low %vm349_vm5, %vm348_vm6  ;;  %2261 = vmatpush3.bf16.msra.mxu0 %v2517_v3 }
  0xc5   : > { %2262 = vmatprep.subr.bf16.mxu0 %v2521_v7 }
  0xc7   : > { %2247 = vmatmul.mubr.msk.bf16.gmra.mxu0 %vm2100_vm7, %v2643_v31  ;;  %v2522_v31 = vld [vmem:[%s3387_s2 + $0x8] ss:$12 sps:$4 sm:$0xff]  }
  0xc8   : > { %2263 = vmatpush3.bf16.msra.mxu0 %v2521_v7 }
  0xc9   : > { %2264 = vmatprep.subr.bf16.mxu0 %v2522_v31 }
  0xcc   : > { %2265 = vmatpush3.bf16.msra.mxu0 %v2522_v31 }
 0x16f   : > { %v2852_v61 = vpop.f32.mrf.mxu0 }
 0x170   : > { %v572_v11 = vrot.slane %v2852_v61, 1  ;;  %v654_v12 = vrot.slane %v2852_v61, 2  ;;  %v736_v22 = vrot.slane %v2852_v61, 3 }
 0x171   : > { %v2854_v62 = vpop.f32.mrf.mxu0 }
 0x172   : > { %v651_v8 = vrot.slane %v2854_v62, 2  ;;  %v569_v13 = vrot.slane %v2854_v62, 1  ;;  %v733_v23 = vrot.slane %v2854_v62, 3 }
 0x173   : > { %v2859_v1 = vpop.f32.mrf.mxu0 }
 0x174   : > { %v574_v17 = vrot.slane %v2859_v1, 1  ;;  %v738_v35 = vrot.slane %v2859_v1, 3  ;;  %v656_v39 = vrot.slane %v2859_v1, 2 }
 0x175   : > { %v2867_v4 = vpop.f32.mrf.mxu0 }
 0x176   : > { %v570_v9 = vrot.slane %v2867_v4, 1  ;;  %v652_v10 = vrot.slane %v2867_v4, 2  ;;  %v734_v15 = vrot.slane %v2867_v4, 3  ;;  %v575_v37 = vsel %vm568_vm9, %v572_v11, %v574_v17 }
 0x177   : > { %v2884_v14 = vpop.f32.mrf.mxu0  ;;  %v739_v49 = vsel %vm732_vm10, %v736_v22, %v738_v35  ;;  %v657_v51 = vsel %vm650_vm8, %v654_v12, %v656_v39 }
 0x178   : > { %v653_v16 = vsel %vm650_vm8, %v651_v8, %v652_v10  ;;  %v655_v19 = vsel %vm650_vm8, %v652_v10, %v654_v12  ;;  %v571_v20 = vsel %vm568_vm9, %v569_v13, %v570_v9  ;;  %v573_v21 = vsel %vm568_vm9, %v570_v9, %v572_v11 }
 0x179   : > { %v2889_v18 = vpop.f32.mrf.mxu0  ;;  %v2368_v26 = vpack.i.bf16 %v655_v19, %v653_v16  ;;  %v2363_v29 = vpack.i.bf16 %v573_v21, %v571_v20  ;;  %v735_v33 = vsel %vm732_vm10, %v733_v23, %v734_v15  ;;  %v737_v34 = vsel %vm732_vm10, %v734_v15, %v736_v22 }
 0x17a   : > { %v576_v24 = vrot.slane %v2889_v18, 1  ;;  %v740_v28 = vrot.slane %v2889_v18, 3  ;;  %v658_v32 = vrot.slane %v2889_v18, 2  ;;  %v2373_v42 = vpack.i.bf16 %v737_v34, %v735_v33 }
 0x17b   : > { %v2899_v30 = vpop.f32.mrf.mxu0  ;;  %2369 = vrot.lane.b32.xlu1 %v2368_v26, %s2645_s11  ;;  %2364 = vrot.lane.b32.xlu0 %v2363_v29, %s2646_s12  ;;  %v662_v47 = vrot.slane %v2884_v14, 2  ;;  %v580_v50 = vrot.slane %v2884_v14, 1  ;;  %v744_v3 = vrot.slane %v2884_v14, 3 }
 0x17c   : > { %v577_v38 = vsel %vm568_vm9, %v574_v17, %v576_v24  ;;  %v741_v44 = vsel %vm732_vm10, %v738_v35, %v740_v28  ;;  %v659_v46 = vsel %vm650_vm8, %v656_v39, %v658_v32  ;;  %v582_v63 = vrot.slane %v2899_v30, 1 }
 0x17d   : > { %v2910_v36 = vpop.f32.mrf.mxu0  ;;  %v2378_v40 = vpack.i.bf16 %v577_v38, %v575_v37  ;;  %v2388_v52 = vpack.i.bf16 %v741_v44, %v739_v49  ;;  %v2383_v54 = vpack.i.bf16 %v659_v46, %v657_v51  ;;  %v746_v13 = vrot.slane %v2899_v30, 3 }
 0x17e   : > { %v660_v41 = vrot.slane %v2910_v36, 2  ;;  %v578_v45 = vrot.slane %v2910_v36, 1  ;;  %v742_v58 = vrot.slane %v2910_v36, 3  ;;  %v583_v15 = vsel %vm568_vm9, %v580_v50, %v582_v63 }
 0x17f   : > { %v2916_v43 = vpop.f32.mrf.mxu0  ;;  %2379 = vrot.lane.b32.xlu1 %v2378_v40, %s2646_s12  ;;  %2374 = vrot.lane.b32.xlu0 %v2373_v42, %s2647_s13  ;;  %v664_v16 = vrot.slane %v2899_v30, 2 }
 0x180   : > { %v661_v56 = vsel %vm650_vm8, %v658_v32, %v660_v41  ;;  %v663_v57 = vsel %vm650_vm8, %v660_v41, %v662_v47  ;;  %v579_v59 = vsel %vm568_vm9, %v576_v24, %v578_v45  ;;  %v581_v60 = vsel %vm568_vm9, %v578_v45, %v580_v50 }
 0x181   : > { %v2924_v48 = vpop.f32.mrf.mxu0  ;;  %v2398_v5 = vpack.i.bf16 %v663_v57, %v661_v56  ;;  %v2393_v7 = vpack.i.bf16 %v581_v60, %v579_v59  ;;  %v743_v11 = vsel %vm732_vm10, %v740_v28, %v742_v58  ;;  %v745_v12 = vsel %vm732_vm10, %v742_v58, %v744_v3 }
 0x182   : > { %v584_v53 = vrot.slane %v2924_v48, 1  ;;  %v748_v6 = vrot.slane %v2924_v48, 3  ;;  %v666_v9 = vrot.slane %v2924_v48, 2  ;;  %v2403_v20 = vpack.i.bf16 %v745_v12, %v743_v11 }
 0x183   : > { %v2930_v55 = vpop.f32.mrf.mxu0  ;;  %2389 = vrot.lane.b32.xlu1 %v2388_v52, %s2647_s13  ;;  %2384 = vrot.lane.b32.xlu0 %v2383_v54, %s2645_s11  ;;  %v670_v26 = vrot.slane %v2916_v43, 2  ;;  %v747_v28 = vsel %vm732_vm10, %v744_v3, %v746_v13  ;;  %v588_v29 = vrot.slane %v2916_v43, 1  ;;  %v665_v31 = vsel %vm650_vm8, %v662_v47, %v664_v16 }
 0x184   : > { %v585_v8 = vsel %vm568_vm9, %v582_v63, %v584_v53  ;;  %v749_v21 = vsel %vm732_vm10, %v746_v13, %v748_v6  ;;  %v667_v24 = vsel %vm650_vm8, %v664_v16, %v666_v9  ;;  %v590_v42 = vrot.slane %v2930_v55, 1 }
 0x185   : > { %v2940_v2 = vpop.f32.mrf.mxu0  ;;  %v2408_v17 = vpack.i.bf16 %v585_v8, %v583_v15  ;;  %v2418_v32 = vpack.i.bf16 %v749_v21, %v747_v28  ;;  %v2413_v34 = vpack.i.bf16 %v667_v24, %v665_v31  ;;  %v752_v44 = vrot.slane %v2916_v43, 3 }
 0x186   : > { %v668_v19 = vrot.slane %v2940_v2, 2  ;;  %v586_v22 = vrot.slane %v2940_v2, 1  ;;  %v750_v38 = vrot.slane %v2940_v2, 3  ;;  %v754_v54 = vrot.slane %v2930_v55, 3 }
 0x187   : > { %2399 = vrot.lane.b32.xlu1 %v2398_v5, %s2645_s11  ;;  %v2947_v10 = vpop.f32.mrf.mxu0  ;;  %2394 = vrot.lane.b32.xlu0 %v2393_v7, %s2646_s12  ;;  %v591_v56 = vsel %vm568_vm9, %v588_v29, %v590_v42  ;;  %v672_v57 = vrot.slane %v2930_v55, 2  ;;  %v600_v12 = vrot.slane %v2644_v27, 1 }
 0x188   : > { %v669_v35 = vsel %vm650_vm8, %v666_v9, %v668_v19  ;;  %v671_v37 = vsel %vm650_vm8, %v668_v19, %v670_v26  ;;  %v587_v40 = vsel %vm568_vm9, %v584_v53, %v586_v22  ;;  %v589_v41 = vsel %vm568_vm9, %v586_v22, %v588_v29 }
 0x189   : > { %v2958_v23 = vpop.f32.mrf.mxu0  ;;  %v2428_v45 = vpack.i.bf16 %v671_v37, %v669_v35  ;;  %v2423_v47 = vpack.i.bf16 %v589_v41, %v587_v40  ;;  %v751_v52 = vsel %vm732_vm10, %v748_v6, %v750_v38  ;;  %v753_v53 = vsel %vm732_vm10, %v750_v38, %v752_v44 }
 0x18a   : > { %v592_v33 = vrot.slane %v2958_v23, 1  ;;  %v756_v46 = vrot.slane %v2958_v23, 3  ;;  %v674_v50 = vrot.slane %v2958_v23, 2  ;;  %v2433_v60 = vpack.i.bf16 %v753_v53, %v751_v52 }
 0x18b   : > { %2409 = vrot.lane.b32.xlu1 %v2408_v17, %s2646_s12  ;;  %2404 = vrot.lane.b32.xlu0 %v2403_v20, %s2647_s13  ;;  %v2971_v39 = vpop.f32.mrf.mxu0  ;;  %v678_v6 = vrot.slane %v2947_v10, 2  ;;  %v755_v7 = vsel %vm732_vm10, %v752_v44, %v754_v54  ;;  %v596_v8 = vrot.slane %v2947_v10, 1  ;;  %v673_v9 = vsel %vm650_vm8, %v670_v26, %v672_v57 }
 0x18c   : > { %v593_v49 = vsel %vm568_vm9, %v590_v42, %v592_v33  ;;  %v757_v63 = vsel %vm732_vm10, %v754_v54, %v756_v46  ;;  %v675_v5 = vsel %vm650_vm8, %v672_v57, %v674_v50  ;;  %v598_v13 = vrot.slane %v2971_v39, 1 }
 0x18d   : > { %v2982_v51 = vpop.f32.mrf.mxu0  ;;  %v2438_v58 = vpack.i.bf16 %v593_v49, %v591_v56  ;;  %v2448_v11 = vpack.i.bf16 %v757_v63, %v755_v7  ;;  %v2443_v15 = vpack.i.bf16 %v675_v5, %v673_v9  ;;  %v760_v22 = vrot.slane %v2947_v10, 3 }
 0x18e   : > { %v676_v59 = vrot.slane %v2982_v51, 2  ;;  %v594_v3 = vrot.slane %v2982_v51, 1  ;;  %v758_v19 = vrot.slane %v2982_v51, 3  ;;  %v764_v26 = vrot.slane %v2644_v27, 3 }
 0x18f   : > { %2419 = vrot.lane.b32.xlu1 %v2418_v32, %s2647_s13  ;;  %2414 = vrot.lane.b32.xlu0 %v2413_v34, %s2645_s11  ;;  %v762_v28 = vrot.slane %v2971_v39, 3  ;;  %v599_v31 = vsel %vm568_vm9, %v596_v8, %v598_v13  ;;  %v601_v32 = vsel %vm568_vm9, %v598_v13, %v600_v12  ;;  %v680_v34 = vrot.slane %v2971_v39, 2 }
 0x190   : > { %v677_v16 = vsel %vm650_vm8, %v674_v50, %v676_v59  ;;  %v679_v17 = vsel %vm650_vm8, %v676_v59, %v678_v6  ;;  %v595_v20 = vsel %vm568_vm9, %v592_v33, %v594_v3  ;;  %v597_v21 = vsel %vm568_vm9, %v594_v3, %v596_v8 }
 0x191   : > { %v2458_v24 = vpack.i.bf16 %v679_v17, %v677_v16  ;;  %v2453_v29 = vpack.i.bf16 %v597_v21, %v595_v20  ;;  %v759_v33 = vsel %vm732_vm10, %v756_v46, %v758_v19  ;;  %v761_v35 = vsel %vm732_vm10, %v758_v19, %v760_v22 }
 0x192   : > { %v682_v37 = vrot.slane %v2644_v27, 2  ;;  %v2468_v38 = vpack.i.bf16 %v601_v32, %v599_v31  ;;  %v2463_v40 = vpack.i.bf16 %v761_v35, %v759_v33  ;;  %v763_v41 = vsel %vm732_vm10, %v760_v22, %v762_v28 }
 0x193   : > { %2429 = vrot.lane.b32.xlu1 %v2428_v45, %s2645_s11  ;;  %2424 = vrot.lane.b32.xlu0 %v2423_v47, %s2646_s12  ;;  %v765_v42 = vsel %vm732_vm10, %v762_v28, %v764_v26  ;;  %v681_v44 = vsel %vm650_vm8, %v678_v6, %v680_v34 }
 0x194   : > { %v683_v45 = vsel %vm650_vm8, %v680_v34, %v682_v37  ;;  %v2478_v46 = vpack.i.bf16 %v765_v42, %v763_v41 }
 0x195   : > { %v2473_v47 = vpack.i.bf16 %v683_v45, %v681_v44 }
 0x197   : > { %2439 = vrot.lane.b32.xlu1 %v2438_v58, %s2646_s12  ;;  %2434 = vrot.lane.b32.xlu0 %v2433_v60, %s2647_s13 }
 0x19b   : > { %2449 = vrot.lane.b32.xlu1 %v2448_v11, %s2647_s13  ;;  %2444 = vrot.lane.b32.xlu0 %v2443_v15, %s2645_s11 }
 0x19f   : > { %2459 = vrot.lane.b32.xlu1 %v2458_v24, %s2645_s11  ;;  %2454 = vrot.lane.b32.xlu0 %v2453_v29, %s2646_s12 }
 0x1a3   : > { %2469 = vrot.lane.b32.xlu1 %v2468_v38, %s2646_s12  ;;  %2464 = vrot.lane.b32.xlu0 %v2463_v40, %s2647_s13  ;;  %s2573_s12 = scalar_lea.vmem %s1983_s29, 128 }
 0x1a4   : > { %p2574_p8 = scmp.ne.s32.totalorder %s1983_s29, %s2573_s12 }
 0x1a6   : > { %p2575_p9 = pnand %p2574_p8, %p2723_p5 }
 0x1a7   : > { %2479 = vrot.lane.b32.xlu1 %v2478_v46, %s2647_s13  ;;  %2474 = vrot.lane.b32.xlu0 %v2473_v47, %s2645_s11  ;;  %s1969_s11 = scalar_lea.sflag [#allocation4], %s258_s16  ;;  %s2649_s13 = smov [#allocation5]  }
 0x1a8   : > { %p2576_p10 = pneg %p2575_p9  ;;  %s2577_s14 = sshll.u32 %s2649_s13, 4  ;;  %s2578_s14 = int_to_ptr.vmem [resolvable:$false] %s2577_s14 }
 0x1a9   : > { %s2579_s25 = scalar_lea.vmem %s2578_s14, 256  ;;  %p2580_p11 = scmp.lt.s32.totalorder %s1983_s29, %s2578_s14 }
 0x1aa   : > { %p2581_p12 = scmp.lt.s32.totalorder %s2579_s25, %s2573_s12 }
 0x1ac   : > { %p2582_p13 = por %p2581_p12, %p2580_p11 }
 0x1ae   : > { %p2583_p0 = pnand %p2582_p13, %p2576_p10 }
 0x1ed   : > { %v2370_v49 = vpop.permute.xlu1 %2369  ;;  %v2365_v50 = vpop.permute.xlu0 %2364 }
 0x1ee   : > { %v2367_v52 = vunpack.i.h.bf16 %v2365_v50  ;;  %v2366_v53 = vunpack.i.l.bf16 %v2365_v50  ;;  %v2372_v54 = vunpack.i.h.bf16 %v2370_v49  ;;  %v2371_v56 = vunpack.i.l.bf16 %v2370_v49 }
 0x1f0   : > { %v816_v57 = vsel %vm814_vm11, %v2867_v4, %v2367_v52  ;;  %v815_v58 = vsel %vm814_vm11, %v2854_v62, %v2366_v53 }
 0x1f1   : > { %v2380_v59 = vpop.permute.xlu1 %2379  ;;  %v2375_v60 = vpop.permute.xlu0 %2374  ;;  %v832_v7 = vsel %vm831_vm12, %v815_v58, %v2371_v56  ;;  %v833_v8 = vsel %vm831_vm12, %v816_v57, %v2372_v54 }
 0x1f2   : > { %v2377_v63 = vunpack.i.h.bf16 %v2375_v60  ;;  %v2376_v3 = vunpack.i.l.bf16 %v2375_v60  ;;  %v2382_v5 = vunpack.i.h.bf16 %v2380_v59  ;;  %v2381_v6 = vunpack.i.l.bf16 %v2380_v59 }
 0x1f4   : > { %v849_v11 = vsel %vm848_vm13, %v832_v7, %v2376_v3  ;;  %v850_v4 = vsel %vm848_vm13, %v833_v8, %v2377_v63  ;;  %v818_v19 = vsel %vm814_vm11, %v2859_v1, %v2382_v5  ;;  %v817_v20 = vsel %vm814_vm11, %v2852_v61, %v2381_v6 }
 0x1f5   : > { %v2390_v9 = vpop.permute.xlu1 %2389  ;;  %v2385_v62 = vpop.permute.xlu0 %2384  ;;  %v865_v15 = vpack.c.bf16 %v850_v4, %v849_v11 }
 0x1f6   : > { %v2392_v12 = vunpack.i.h.bf16 %v2390_v9  ;;  %v2391_v13 = vunpack.i.l.bf16 %v2390_v9  ;;  %v2387_v16 = vunpack.i.h.bf16 %v2385_v62  ;;  %v2386_v17 = vunpack.i.l.bf16 %v2385_v62 }
 0x1f7   : > { %1083 = vmatmul.mubr.bf16.vlgmr.msra.gmra.mxu1 %v865_v15  ;;  %2266 = vmatprep.mubr.bf16.mxu0 %v865_v15 }
 0x1f8   : > { %v835_v21 = vsel %vm831_vm12, %v818_v19, %v2387_v16  ;;  %v834_v22 = vsel %vm831_vm12, %v817_v20, %v2386_v17  ;;  %1092 = vmatprep.mubr.bf16.mxu1 %v2642_v0 }
 0x1f9   : > { %v2400_v24 = vpop.permute.xlu1 %2399  ;;  %v852_v26 = vsel %vm848_vm13, %v835_v21, %v2392_v12  ;;  %v851_v28 = vsel %vm848_vm13, %v834_v22, %v2391_v13  ;;  %v2395_v29 = vpop.permute.xlu0 %2394 }
 0x1fa   : > { %v866_v31 = vpack.c.bf16 %v852_v26, %v851_v28  ;;  %v2397_v32 = vunpack.i.h.bf16 %v2395_v29  ;;  %v2396_v1 = vunpack.i.l.bf16 %v2395_v29  ;;  %v2402_v34 = vunpack.i.h.bf16 %v2400_v24 }
 0x1fb   : > { %v2401_v33 = vunpack.i.l.bf16 %v2400_v24 }
 0x1fc   : > { %v820_v61 = vsel %vm814_vm11, %v2910_v36, %v2397_v32  ;;  %v819_v35 = vsel %vm814_vm11, %v2889_v18, %v2396_v1  ;;  %2267 = vmatmul.mubr.bf16.vlgmr.msra.gmra.mxu0 %v866_v31 }
 0x1fd   : > { %v2410_v37 = vpop.permute.xlu1 %2409  ;;  %v2405_v38 = vpop.permute.xlu0 %2404  ;;  %v836_v45 = vsel %vm831_vm12, %v819_v35, %v2401_v33  ;;  %v837_v46 = vsel %vm831_vm12, %v820_v61, %v2402_v34 }
 0x1fe   : > { %v2407_v40 = vunpack.i.h.bf16 %v2405_v38  ;;  %v2406_v41 = vunpack.i.l.bf16 %v2405_v38  ;;  %v2412_v42 = vunpack.i.h.bf16 %v2410_v37  ;;  %v2411_v44 = vunpack.i.l.bf16 %v2410_v37 }
 0x1ff   : > { %1093 = vmatmul.mubr.bf16.gmra.mxu1 %v866_v31 }
 0x200   : > { %v853_v49 = vsel %vm848_vm13, %v836_v45, %v2406_v41  ;;  %v854_v36 = vsel %vm848_vm13, %v837_v46, %v2407_v40  ;;  %1102 = vmatprep.mubr.bf16.mxu1 %v2642_v0  ;;  %v822_v57 = vsel %vm814_vm11, %v2899_v30, %v2412_v42  ;;  %v821_v58 = vsel %vm814_vm11, %v2884_v14, %v2411_v44 }
 0x201   : > { %v2420_v47 = vpop.permute.xlu1 %2419  ;;  %v2415_v52 = vpop.permute.xlu0 %2414  ;;  %v867_v53 = vpack.c.bf16 %v854_v36, %v853_v49 }
 0x202   : > { %v2422_v18 = vunpack.i.h.bf16 %v2420_v47  ;;  %v2421_v50 = vunpack.i.l.bf16 %v2420_v47  ;;  %v2417_v54 = vunpack.i.h.bf16 %v2415_v52  ;;  %v2416_v56 = vunpack.i.l.bf16 %v2415_v52 }
 0x203   : > { %2270 = vmatprep.mubr.bf16.mxu0 %v867_v53 }
 0x204   : > { %v839_v59 = vsel %vm831_vm12, %v822_v57, %v2417_v54  ;;  %v838_v60 = vsel %vm831_vm12, %v821_v58, %v2416_v56 }
 0x205   : > { %v2430_v63 = vpop.permute.xlu1 %2429  ;;  %v2425_v3 = vpop.permute.xlu0 %2424  ;;  %v855_v5 = vsel %vm848_vm13, %v838_v60, %v2421_v50  ;;  %v856_v6 = vsel %vm848_vm13, %v839_v59, %v2422_v18 }
 0x206   : > { %v2427_v7 = vunpack.i.h.bf16 %v2425_v3  ;;  %v2426_v8 = vunpack.i.l.bf16 %v2425_v3  ;;  %v868_v9 = vpack.c.bf16 %v856_v6, %v855_v5  ;;  %v2432_v11 = vunpack.i.h.bf16 %v2430_v63 }
 0x207   : > { %v2431_v4 = vunpack.i.l.bf16 %v2430_v63  ;;  %1103 = vmatmul.mubr.bf16.gmra.mxu1 %v867_v53 }
 0x208   : > { %v824_v14 = vsel %vm814_vm11, %v2940_v2, %v2427_v7  ;;  %v823_v30 = vsel %vm814_vm11, %v2924_v48, %v2426_v8  ;;  %2271 = vmatmul.mubr.bf16.gmra.mxu0 %v868_v9  ;;  %1112 = vmatprep.mubr.bf16.mxu1 %v2642_v0 }
 0x209   : > { %v2440_v12 = vpop.permute.xlu1 %2439  ;;  %v2435_v13 = vpop.permute.xlu0 %2434  ;;  %v840_v19 = vsel %vm831_vm12, %v823_v30, %v2431_v4  ;;  %v841_v20 = vsel %vm831_vm12, %v824_v14, %v2432_v11  ;;  %v2525_v4 = vld [vmem:[#allocation2 + $0xa8] sm:$0xff]   ;;  %v2526_v14 = vld [vmem:[#allocation2 + $0xa0] sm:$0xff]   ;;  %v2527_v30 = vld [vmem:[#allocation2 + $0x78] sm:$0xff]  }
 0x20a   : > { %v2437_v62 = vunpack.i.h.bf16 %v2435_v13  ;;  %v2436_v15 = vunpack.i.l.bf16 %v2435_v13  ;;  %v2442_v16 = vunpack.i.h.bf16 %v2440_v12  ;;  %v2441_v17 = vunpack.i.l.bf16 %v2440_v12  ;;  %v2528_v12 = vld [vmem:[#allocation2 + $0x38] sm:$0xff]   ;;  %2187 = vmatprep.subr.bf16.mxu0 %v2527_v30  ;;  %v2530_v13 = vld [vmem:[#allocation2 + $0x70] sm:$0xff]  }
 0x20b   : > { %2188 = vmatpush3.bf16.msra.mxu0 %v2528_v12 }
 0x20c   : > { %v857_v22 = vsel %vm848_vm13, %v840_v19, %v2436_v15  ;;  %v858_v2 = vsel %vm848_vm13, %v841_v20, %v2437_v62  ;;  %v826_v32 = vsel %vm814_vm11, %v2930_v55, %v2442_v16  ;;  %v825_v1 = vsel %vm814_vm11, %v2916_v43, %v2441_v17  ;;  %v2531_v62 = vld [vmem:[#allocation2 + $0x30] sm:$0xff]   ;;  %2189 = vmatprep.subr.bf16.mxu0 %v2530_v13  ;;  %v2533_v16 = vld [vmem:[#allocation2 + $0x68] sm:$0xff]   ;;  %v2536_v20 = vld [vmem:[#allocation2 + $0x60] sm:$0xff]  }
 0x20d   : > { %v2450_v21 = vpop.permute.xlu1 %2449  ;;  %v2445_v26 = vpop.permute.xlu0 %2444  ;;  %v869_v28 = vpack.c.bf16 %v858_v2, %v857_v22  ;;  %v2532_v15 = vld [vmem:[#allocation2 + $0x90] sm:$0xff]   ;;  %v2534_v17 = vld [vmem:[#allocation2 + $0x28] sm:$0xff]   ;;  %v2538_v22 = vld [vmem:[#allocation2 + $0x80] sm:$0xff]  }
 0x20e   : > { %v2452_v24 = vunpack.i.h.bf16 %v2450_v21  ;;  %v2451_v48 = vunpack.i.l.bf16 %v2450_v21  ;;  %v2447_v29 = vunpack.i.h.bf16 %v2445_v26  ;;  %v2446_v31 = vunpack.i.l.bf16 %v2445_v26  ;;  %v2535_v19 = vld [vmem:[#allocation2 + $0x88] sm:$0xff]   ;;  %v2537_v21 = vld [vmem:[#allocation2 + $0x20] sm:$0xff]   ;;  %v2539_v2 = vld [vmem:[#allocation2 + $0x58] sm:$0xff]  }
 0x20f   : > { %1113 = vmatmul.mubr.bf16.gmra.mxu1 %v868_v9  ;;  %2274 = vmatprep.mubr.bf16.mxu0 %v869_v28  ;;  %v2542_v26 = vld [vmem:[#allocation2 + $0x10] sm:$0xff]  }
 0x210   : > { %v843_v34 = vsel %vm831_vm12, %v826_v32, %v2447_v29  ;;  %v842_v33 = vsel %vm831_vm12, %v825_v1, %v2446_v31  ;;  %1122 = vmatprep.mubr.bf16.mxu1 %v2642_v0  ;;  %2190 = vmatpush3.bf16.msra.mxu0 %v2531_v62  ;;  %v2544_v29 = vld [vmem:[#allocation2 + $0x8] sm:$0xff]   ;;  %v2545_v31 = vld [vmem:[#allocation2 + $0x40] sm:$0xff]   ;;  %v908_v32 = vshrl.u32 %v284_v25, 7 }
 0x211   : > { %v2460_v61 = vpop.permute.xlu1 %2459  ;;  %v2455_v35 = vpop.permute.xlu0 %2454  ;;  %v859_v37 = vsel %vm848_vm13, %v842_v33, %v2451_v48  ;;  %v860_v38 = vsel %vm848_vm13, %v843_v34, %v2452_v24  ;;  %2191 = vmatprep.subr.bf16.mxu0 %v2533_v16  ;;  %v2540_v24 = vld [vmem:[#allocation2 + $0x18] sm:$0xff]   ;;  %v2541_v48 = vld [vmem:[#allocation2 + $0x50] sm:$0xff]   ;;  %v2546_v1 = vld [vmem:[#allocation2] sm:$0xff]  }
 0x212   : > { %v2457_v40 = vunpack.i.h.bf16 %v2455_v35  ;;  %v2456_v41 = vunpack.i.l.bf16 %v2455_v35  ;;  %v870_v55 = vpack.c.bf16 %v860_v38, %v859_v37  ;;  %v2462_v42 = vunpack.i.h.bf16 %v2460_v61 }
 0x213   : > { %v2461_v44 = vunpack.i.l.bf16 %v2460_v61  ;;  %v909_v34 = vsub.s32 0, %v908_v32  ;;  %v913_v33 = vsub.s32 1, %v908_v32  ;;  %v917_v38 = vsub.s32 2, %v908_v32 }
 0x214   : > { %v828_v43 = vsel %vm814_vm11, %v2982_v51, %v2457_v40  ;;  %v827_v45 = vsel %vm814_vm11, %v2958_v23, %v2456_v41  ;;  %2275 = vmatmul.mubr.bf16.gmra.mxu0 %v870_v55  ;;  %v3117_v25 = vadd.s32 8, %v908_v32 }
 0x215   : > { %v2470_v46 = vpop.permute.xlu1 %2469  ;;  %v2465_v47 = vpop.permute.xlu0 %2464  ;;  %v844_v52 = vsel %vm831_vm12, %v827_v45, %v2461_v44  ;;  %v845_v53 = vsel %vm831_vm12, %v828_v43, %v2462_v42  ;;  %2192 = vmatpush3.bf16.msra.mxu0 %v2534_v17 }
 0x216   : > { %v2467_v49 = vunpack.i.h.bf16 %v2465_v47  ;;  %v2466_v36 = vunpack.i.l.bf16 %v2465_v47  ;;  %v2472_v18 = vunpack.i.h.bf16 %v2470_v46  ;;  %v2471_v50 = vunpack.i.l.bf16 %v2470_v46  ;;  %2193 = vmatprep.subr.bf16.mxu0 %v2536_v20 }
 0x217   : > { %1123 = vmatmul.mubr.bf16.gmra.mxu1 %v869_v28  ;;  %v2543_v28 = vld [vmem:[#allocation2 + $0x48] sm:$0xff]   ;;  %vm1408_vm15 = vcmp.lt.s32.totalorder %v3117_v25, 15  ;;  %vm1482_vm3 = vcmp.lt.s32.totalorder %v3117_v25, 14  ;;  %vm1556_vm5 = vcmp.lt.s32.totalorder %v3117_v25, 13 }
 0x218   : > { %v861_v56 = vsel %vm848_vm13, %v844_v52, %v2466_v36  ;;  %v862_v51 = vsel %vm848_vm13, %v845_v53, %v2467_v49  ;;  %1132 = vmatprep.mubr.bf16.mxu1 %v2642_v0  ;;  %v830_v3 = vsel %vm814_vm11, %v2971_v39, %v2472_v18  ;;  %v829_v5 = vsel %vm814_vm11, %v2947_v10, %v2471_v50  ;;  %v2523_v39 = vld [vmem:[#allocation2 + $0xb8] sm:$0xff]   ;;  %v2524_v10 = vld [vmem:[#allocation2 + $0xb0] sm:$0xff]  }
 0x219   : > { %v2480_v54 = vpop.permute.xlu1 %2479  ;;  %v2475_v58 = vpop.permute.xlu0 %2474  ;;  %v871_v59 = vpack.c.bf16 %v862_v51, %v861_v56  ;;  %2283 = vmatpush3.bf16.msra.mxu1 %v2523_v39  ;;  %2194 = vmatpush3.bf16.msra.mxu0 %v2537_v21 }
 0x21a   : > { %v2482_v23 = vunpack.i.h.bf16 %v2480_v54  ;;  %v2481_v57 = vunpack.i.l.bf16 %v2480_v54  ;;  %v2477_v60 = vunpack.i.h.bf16 %v2475_v58  ;;  %v2476_v63 = vunpack.i.l.bf16 %v2475_v58  ;;  %2284 = vmatprep.subr.bf16.mxu1 %v2644_v27  ;;  %2195 = vmatprep.subr.bf16.mxu0 %v2539_v2 }
 0x21b   : > { %2278 = vmatprep.mubr.bf16.mxu0 %v871_v59 }
 0x21c   : > { %v847_v6 = vsel %vm831_vm12, %v830_v3, %v2477_v60  ;;  %v846_v7 = vsel %vm831_vm12, %v829_v5, %v2476_v63 }
 0x21d   : > { %v863_v8 = vsel %vm848_vm13, %v846_v7, %v2481_v57  ;;  %v864_v9 = vsel %vm848_vm13, %v847_v6, %v2482_v23  ;;  %2285 = vmatpush3.bf16.msra.mxu1 %v2524_v10  ;;  %2196 = vmatpush3.bf16.msra.mxu0 %v2540_v24 }
 0x21e   : > { %v872_v11 = vpack.c.bf16 %v864_v9, %v863_v8  ;;  %2286 = vmatprep.subr.bf16.mxu1 %v2644_v27  ;;  %2197 = vmatprep.subr.bf16.mxu0 %v2541_v48 }
 0x21f   : > { %1133 = vmatmul.mubr.bf16.gmra.mxu1 %v870_v55 }
 0x220   : > { %2279 = vmatmul.mubr.bf16.gmra.mxu0 %v872_v11  ;;  %1142 = vmatprep.mubr.bf16.mxu1 %v2642_v0 }
 0x221   : > { %2287 = vmatpush3.bf16.msra.mxu1 %v2525_v4  ;;  %2198 = vmatpush3.bf16.msra.mxu0 %v2542_v26 }
 0x222   : > { %2288 = vmatprep.subr.bf16.mxu1 %v2644_v27  ;;  %2199 = vmatprep.subr.bf16.mxu0 %v2543_v28 }
 0x225   : > { %2289 = vmatpush3.bf16.msra.mxu1 %v2526_v14  ;;  %2200 = vmatpush3.bf16.msra.mxu0 %v2544_v29 }
 0x226   : > { %2290 = vmatprep.subr.bf16.mxu1 %v2644_v27  ;;  %2201 = vmatprep.subr.bf16.mxu0 %v2545_v31 }
 0x227   : > { %1143 = vmatmul.mubr.bf16.gmra.mxu1 %v871_v59 }
 0x228   : > { %1152 = vmatprep.mubr.bf16.mxu1 %v2642_v0  ;;  %v2529_v0 = vld [vmem:[#allocation2 + $0x98] sm:$0xff]  }
 0x229   : > { %2291 = vmatpush3.bf16.msra.mxu1 %v2529_v0  ;;  %2202 = vmatpush3.bf16.msra.mxu0 %v2546_v1 }
 0x22a   : > { %2292 = vmatprep.subr.bf16.mxu1 %v2644_v27 }
 0x22d   : > { %2293 = vmatpush3.bf16.msra.mxu1 %v2532_v15 }
 0x22e   : > { %2294 = vmatprep.subr.bf16.mxu1 %v2644_v27 }
 0x22f   : > { %1153 = vmatmul.mubr.bf16.gmra.mxu1 %v872_v11 }
 0x230   : > { %2298 = vmatprep.mubr.msk.bf16.mxu1 %vm2648_vm14, %v2644_v27 }
 0x231   : > { %2295 = vmatpush3.bf16.msra.mxu1 %v2535_v19 }
 0x232   : > { %2296 = vmatprep.subr.bf16.mxu1 %v2644_v27  ;;  %v905_v27 = vld [vmem:[%s3388_s3] sm:$0x7] }
 0x233   : > { %v3112_v61 = vrot.slane %v905_v27, %v909_v34  ;;  %v3114_v37 = vrot.slane %v905_v27, %v913_v33  ;;  %v3121_v43 = vrot.slane %v905_v27, %v917_v38 }
 0x235   : > { %2297 = vmatpush3.bf16.msra.mxu1 %v2538_v22 }
 0x2b7   : > { %v1084_v35 = vpop.f32.mrf.mxu1 }
 0x2b8   : > { %v1085_v40 = vadd.f32 %v1084_v35, %v3112_v61 }
 0x2b9   : > { %v1086_v41 = vpop.f32.mrf.mxu1 }
 0x2ba   : > { %v1087_v55 = vadd.f32 %v1086_v41, %v3114_v37  ;;  %v1308_v46 = vmul.f32 0.01, %v1085_v40  ;;  %vm1260_vm0 = vcmp.ge.f32.partialorder %v1085_v40, 0.0 }
 0x2bb   : > { %v1088_v42 = vpop.f32.mrf.mxu1 }
 0x2bc   : > { %v1089_v44 = vadd.f32 %v1088_v42, %v3112_v61  ;;  %v2268_v45 = vpop.f32.mrf.mxu0  ;;  %vm1261_vm2 = vcmp.ge.f32.partialorder %v1087_v55, 0.0  ;;  %v1309_v50 = vmul.f32 0.01, %v1087_v55  ;;  %v1356_v23 = vsel %vm1260_vm0, %v1085_v40, %v1308_v46 }
 0x2bd   : > { %v1090_v47 = vpop.f32.mrf.mxu1  ;;  %v1206_v54 = vadd.f32 %v2268_v45, %v3121_v43 }
 0x2be   : > { %vm1263_vm1 = vcmp.ge.f32.partialorder %v1089_v44, 0.0  ;;  %v1311_v49 = vmul.f32 0.01, %v1089_v44  ;;  %v1091_v36 = vadd.f32 %v1090_v47, %v3114_v37  ;;  %v1197_v18 = vpop.f32.mrf.mxu0  ;;  %v1357_v3 = vsel %vm1261_vm2, %v1087_v55, %v1309_v50 }
 0x2bf   : > { %v1094_v52 = vpop.f32.mrf.mxu1  ;;  %vm1268_vm6 = vcmp.ge.f32.partialorder %v1206_v54, 0.0  ;;  %v1316_v9 = vmul.f32 0.01, %v1206_v54  ;;  %v1198_v10 = vadd.f32 %v1197_v18, %v3121_v43 }
 0x2c0   : > { %v1359_v53 = vsel %vm1263_vm1, %v1089_v44, %v1311_v49  ;;  %vm1264_vm4 = vcmp.ge.f32.partialorder %v1091_v36, 0.0  ;;  %v1312_v56 = vmul.f32 0.01, %v1091_v36  ;;  %v2269_v51 = vpop.f32.mrf.mxu0  ;;  %v1095_v12 = vadd.f32 %v1094_v52, %v3112_v61 }
 0x2c1   : > { %v1410_v57 = vsel %vm1408_vm15, %v1359_v53, -inf  ;;  %v1096_v58 = vpop.f32.mrf.mxu1  ;;  %v1209_v6 = vadd.f32 %v2269_v51, %v3121_v43  ;;  %v1364_v16 = vsel %vm1268_vm6, %v1206_v54, %v1316_v9  ;;  %v1310_v21 = vmul.f32 0.01, %v1198_v10 }
 0x2c2   : > { %v1425_v59 = vmax.f32 %v1356_v23, %v1410_v57  ;;  %v1360_v60 = vsel %vm1264_vm4, %v1091_v36, %v1312_v56  ;;  %v1200_v63 = vpop.f32.mrf.mxu0  ;;  %vm1262_vm10 = vcmp.ge.f32.partialorder %v1198_v10, 0.0  ;;  %v1097_v32 = vadd.f32 %v1096_v58, %v3114_v37 }
 0x2c3   : > { %v1484_v5 = vsel %vm1482_vm3, %v1360_v60, -inf  ;;  %v1098_v7 = vpop.f32.mrf.mxu1  ;;  %v1201_v11 = vadd.f32 %v1200_v63, %v3121_v43  ;;  %vm1271_vm7 = vcmp.ge.f32.partialorder %v1209_v6, 0.0  ;;  %v1319_v4 = vmul.f32 0.01, %v1209_v6 }
 0x2c4   : > { %v1426_v8 = vrot.slane %v1425_v59, 4  ;;  %v1499_v39 = vmax.f32 %v1357_v3, %v1484_v5  ;;  %v1099_v13 = vadd.f32 %v1098_v7, %v3112_v61  ;;  %v1358_v27 = vsel %vm1262_vm10, %v1198_v10, %v1310_v21 }
 0x2c5   : > { %v1100_v14 = vpop.f32.mrf.mxu1  ;;  %vm1265_vm8 = vcmp.ge.f32.partialorder %v1201_v11, 0.0  ;;  %v1313_v30 = vmul.f32 0.01, %v1201_v11  ;;  %v1367_v0 = vsel %vm1271_vm7, %v1209_v6, %v1319_v4  ;;  %v1314_v33 = vmul.f32 0.01, %v1095_v12 }
 0x2c6   : > { %v1427_v15 = vmax.f32 %v1425_v59, %v1426_v8  ;;  %v1560_v17 = vsel %vm1556_vm5, %v1367_v0, -inf  ;;  %v1500_v20 = vrot.slane %v1499_v39, 4  ;;  %vm1269_vm9 = vcmp.ge.f32.partialorder %v1099_v13, 0.0 }
 0x2c7   : > { %v1104_v62 = vpop.f32.mrf.mxu1  ;;  %v1361_v19 = vsel %vm1265_vm8, %v1201_v11, %v1313_v30  ;;  %v1317_v22 = vmul.f32 0.01, %v1099_v13  ;;  %v1580_v48 = vmax.f32 %v1364_v16, %v1560_v17  ;;  %v1101_v26 = vadd.f32 %v1100_v14, %v3114_v37 }
 0x2c8   : > { %v2272_v2 = vpop.f32.mrf.mxu0  ;;  %v1558_v28 = vsel %vm1556_vm5, %v1361_v19, -inf  ;;  %v1428_v31 = vrot.slane %v1427_v15, 2  ;;  %v1501_v34 = vmax.f32 %v1499_v39, %v1500_v20  ;;  %vm1266_vm11 = vcmp.ge.f32.partialorder %v1095_v12, 0.0 }
 0x2c9   : > { %v1106_v24 = vpop.f32.mrf.mxu1  ;;  %v1365_v1 = vsel %vm1269_vm9, %v1099_v13, %v1317_v22  ;;  %v1581_v40 = vrot.slane %v1580_v48, 4  ;;  %v1573_v41 = vmax.f32 %v1358_v27, %v1558_v28  ;;  %v1318_v55 = vmul.f32 0.01, %v1101_v26 }
 0x2ca   : > { %v1213_v35 = vpop.f32.mrf.mxu0  ;;  %v1412_v42 = vsel %vm1408_vm15, %v1365_v1, -inf  ;;  %vm1270_vm12 = vcmp.ge.f32.partialorder %v1101_v26, 0.0  ;;  %v3147_v45 = vmax.f32 %v1427_v15, %v1428_v31  ;;  %v1315_v46 = vmul.f32 0.01, %v1097_v32 }
 0x2cb   : > { %v1108_v29 = vpop.f32.mrf.mxu1  ;;  %v1502_v47 = vrot.slane %v1501_v34, 2  ;;  %v1362_v49 = vsel %vm1266_vm11, %v1095_v12, %v1314_v33  ;;  %vm1267_vm13 = vcmp.ge.f32.partialorder %v1097_v32, 0.0  ;;  %v1105_v36 = vadd.f32 %v1104_v62, %v3112_v61 }
 0x2cc   : > { %v2273_v18 = vpop.f32.mrf.mxu0  ;;  %v1582_v52 = vmax.f32 %v1580_v48, %v1581_v40  ;;  %v1574_v53 = vrot.slane %v1573_v41, 4  ;;  %v1432_v54 = vmax.f32 %v1362_v49, %v1412_v42  ;;  %v1366_v56 = vsel %vm1270_vm12, %v1101_v26, %v1318_v55 }
 0x2cd   : > { %v1110_v38 = vpop.f32.mrf.mxu1  ;;  %v1430_v23 = vrot.slane %v3147_v45, 1  ;;  %v1363_v57 = vsel %vm1267_vm13, %v1097_v32, %v1315_v46  ;;  %v1109_v58 = vadd.f32 %v1108_v29, %v3112_v61  ;;  %v3154_v59 = vmax.f32 %v1501_v34, %v1502_v47 }
 0x2ce   : > { %v1486_v60 = vsel %vm1482_vm3, %v1366_v56, -inf  ;;  %vm1272_vm14 = vcmp.ge.f32.partialorder %v1105_v36, 0.0  ;;  %v1222_v63 = vadd.f32 %v2272_v2, %v3121_v43  ;;  %v1216_v3 = vpop.f32.mrf.mxu0  ;;  %v1583_v6 = vrot.slane %v1582_v52, 2 }
 0x2cf   : > { %v3145_v44 = vpop.f32.mrf.mxu1  ;;  %v1575_v7 = vmax.f32 %v1573_v41, %v1574_v53  ;;  %v1433_v8 = vrot.slane %v1432_v54, 4  ;;  %vm1275_vm0 = vcmp.ge.f32.partialorder %v1109_v58, 0.0  ;;  %v1320_v9 = vmul.f32 0.01, %v1105_v36 }
 0x2d0   : > { %v1214_v11 = vadd.f32 %v1213_v35, %v3121_v43  ;;  %v1323_v39 = vmul.f32 0.01, %v1109_v58  ;;  %v1225_v10 = vadd.f32 %v2273_v18, %v3121_v43  ;;  %v1506_v14 = vmax.f32 %v1363_v57, %v1486_v60 }
 0x2d1   : > { %v3150_v50 = vpop.f32.mrf.mxu1  ;;  %v1107_v30 = vadd.f32 %v1106_v24, %v3114_v37  ;;  %v1111_v12 = vadd.f32 %v1110_v38, %v3114_v37  ;;  %v1217_v0 = vadd.f32 %v1216_v3, %v3121_v43  ;;  %vm1280_vm1 = vcmp.ge.f32.partialorder %v1222_v63, 0.0 }
 0x2d2   : > { %v1328_v13 = vmul.f32 0.01, %v1222_v63  ;;  %v1371_v62 = vsel %vm1275_vm0, %v1109_v58, %v1323_v39  ;;  %vm1283_vm2 = vcmp.ge.f32.partialorder %v1225_v10, 0.0  ;;  %v1331_v16 = vmul.f32 0.01, %v1225_v10 }
 0x2d3   : > { %v1118_v51 = vpop.f32.mrf.mxu1  ;;  %v1414_v15 = vsel %vm1408_vm15, %v1371_v62, -inf  ;;  %vm1276_vm4 = vcmp.ge.f32.partialorder %v1111_v12, 0.0  ;;  %v1324_v17 = vmul.f32 0.01, %v1111_v12  ;;  %v1368_v19 = vsel %vm1272_vm14, %v1105_v36, %v1320_v9 }
 0x2d4   : > { %vm1274_vm6 = vcmp.ge.f32.partialorder %v1214_v11, 0.0  ;;  %v1322_v20 = vmul.f32 0.01, %v1214_v11  ;;  %vm1277_vm7 = vcmp.ge.f32.partialorder %v1217_v0, 0.0  ;;  %v1439_v22 = vmax.f32 %v1368_v19, %v1414_v15  ;;  %v2276_v40 = vpop.f32.mrf.mxu0 }
 0x2d5   : > { %v3159_v5 = vpop.f32.mrf.mxu1  ;;  %v1379_v2 = vsel %vm1283_vm2, %v1225_v10, %v1331_v16  ;;  %v1372_v24 = vsel %vm1276_vm4, %v1111_v12, %v1324_v17  ;;  %v1325_v48 = vmul.f32 0.01, %v1217_v0  ;;  %v1576_v26 = vrot.slane %v1575_v7, 2 }
 0x2d6   : > { %v1376_v28 = vsel %vm1280_vm1, %v1222_v63, %v1328_v13  ;;  %v1321_v29 = vmul.f32 0.01, %v1107_v30  ;;  %v1564_v31 = vsel %vm1556_vm5, %v1379_v2, -inf  ;;  %v1584_v32 = vmax.f32 %v1582_v52, %v1583_v6 }
 0x2d7   : > { %v3163_v4 = vpop.f32.mrf.mxu1  ;;  %vm1273_vm8 = vcmp.ge.f32.partialorder %v1107_v30, 0.0  ;;  %v1594_v1 = vmax.f32 %v1376_v28, %v1564_v31  ;;  %v1373_v34 = vsel %vm1277_vm7, %v1217_v0, %v1325_v48  ;;  %v1434_v27 = vmax.f32 %v1432_v54, %v1433_v8 }
 0x2d8   : > { %v1370_v33 = vsel %vm1274_vm6, %v1214_v11, %v1322_v20  ;;  %v1488_v35 = vsel %vm1482_vm3, %v1372_v24, -inf  ;;  %v1562_v38 = vsel %vm1556_vm5, %v1373_v34, -inf  ;;  %v1507_v55 = vrot.slane %v1506_v14, 4 }
 0x2d9   : > { %v3171_v21 = vpop.f32.mrf.mxu1  ;;  %v1440_v42 = vrot.slane %v1439_v22, 4  ;;  %v1587_v46 = vmax.f32 %v1370_v33, %v1562_v38  ;;  %v1119_v47 = vadd.f32 %v1118_v51, %v3112_v61  ;;  %v1504_v49 = vrot.slane %v3154_v59, 1  ;;  %v1229_v51 = vpop.f32.mrf.mxu0 }
 0x2da   : > { %v1369_v36 = vsel %vm1273_vm8, %v1107_v30, %v1321_v29  ;;  %v1595_v18 = vrot.slane %v1594_v1, 4  ;;  %v1115_v52 = vadd.f32 %v3145_v44, %v3112_v61  ;;  %v1577_v53 = vmax.f32 %v1575_v7, %v1576_v26 }
 0x2db   : > { %v3181_v41 = vpop.f32.mrf.mxu1  ;;  %v1513_v54 = vmax.f32 %v1369_v36, %v1488_v35  ;;  %v1588_v56 = vrot.slane %v1587_v46, 4  ;;  %vm1281_vm9 = vcmp.ge.f32.partialorder %v1119_v47, 0.0  ;;  %v3190_v57 = vmax.f32 %v3147_v45, %v1430_v23 }
 0x2dc   : > { %v1585_v58 = vrot.slane %v1584_v32, 1  ;;  %v1435_v60 = vrot.slane %v1434_v27, 2  ;;  %v1329_v63 = vmul.f32 0.01, %v1119_v47  ;;  %v1508_v6 = vmax.f32 %v1506_v14, %v1507_v55 }
 0x2dd   : > { %v3192_v3 = vpop.f32.mrf.mxu1  ;;  %v1441_v8 = vmax.f32 %v1439_v22, %v1440_v42  ;;  %v1589_v9 = vmax.f32 %v1587_v46, %v1588_v56  ;;  %v1121_v44 = vadd.f32 %v3159_v5, %v3114_v37  ;;  %v1596_v7 = vmax.f32 %v1594_v1, %v1595_v18  ;;  %v2277_v5 = vpop.f32.mrf.mxu0 }
 0x2de   : > { %v1326_v11 = vmul.f32 0.01, %v1115_v52  ;;  %v1117_v39 = vadd.f32 %v3150_v50, %v3114_v37  ;;  %v1377_v10 = vsel %vm1281_vm9, %v1119_v47, %v1329_v63  ;;  %v3199_v45 = vmax.f32 %v3154_v59, %v1504_v49 }
 0x2df   : > { %v1578_v23 = vrot.slane %v1577_v53, 1  ;;  %v1514_v30 = vrot.slane %v1513_v54, 4  ;;  %vm1278_vm10 = vcmp.ge.f32.partialorder %v1115_v52, 0.0  ;;  %v3201_v12 = vmax.f32 %v1584_v32, %v1585_v58  ;;  %v3206_v13 = vpop.f32.mrf.mxu1  ;;  %v1232_v31 = vpop.f32.mrf.mxu0 }
 0x2e0   : > { %v1416_v14 = vsel %vm1408_vm15, %v1377_v10, -inf  ;;  %v1238_v0 = vadd.f32 %v2276_v40, %v3121_v43  ;;  %vm1282_vm11 = vcmp.ge.f32.partialorder %v1121_v44, 0.0  ;;  %v3208_v62 = vmax.f32 %v1434_v27, %v1435_v60 }
 0x2e1   : > { %v1509_v50 = vrot.slane %v1508_v6, 2  ;;  %v1590_v15 = vrot.slane %v1589_v9, 2  ;;  %v1330_v59 = vmul.f32 0.01, %v1121_v44  ;;  %v1442_v16 = vrot.slane %v1441_v8, 2  ;;  %v3217_v32 = vpop.f32.mrf.mxu1 }
 0x2e2   : > { %v1597_v17 = vrot.slane %v1596_v7, 2  ;;  %v1374_v19 = vsel %vm1278_vm10, %v1115_v52, %v1326_v11  ;;  %v1327_v20 = vmul.f32 0.01, %v1117_v39  ;;  %v3210_v22 = vmax.f32 %v1513_v54, %v1514_v30 }
 0x2e3   : > { %vm1279_vm12 = vcmp.ge.f32.partialorder %v1117_v39, 0.0  ;;  %v1446_v2 = vmax.f32 %v1374_v19, %v1416_v14  ;;  %v1378_v24 = vsel %vm1282_vm11, %v1121_v44, %v1330_v59  ;;  %v3212_v48 = vmax.f32 %v1577_v53, %v1578_v23  ;;  %v1138_v52 = vpop.f32.mrf.mxu1  ;;  %v2280_v44 = vpop.f32.mrf.mxu0 }
 0x2e4   : > { %v1340_v26 = vmul.f32 0.01, %v1238_v0  ;;  %v1490_v28 = vsel %vm1482_vm3, %v1378_v24, -inf  ;;  %v1230_v29 = vadd.f32 %v1229_v51, %v3121_v43  ;;  %v1437_v1 = vrot.slane %v3208_v62, 1 }
 0x2e5   : > { %v3220_v34 = vmax.f32 %v1508_v6, %v1509_v50  ;;  %v1591_v27 = vmax.f32 %v1589_v9, %v1590_v15  ;;  %vm1292_vm13 = vcmp.ge.f32.partialorder %v1238_v0, 0.0  ;;  %vm1637_vm14 = vcmask 1041409  }
 0x2e6   : > { %v3222_v33 = vmax.f32 %v1441_v8, %v1442_v16  ;;  %v1598_v35 = vmax.f32 %v1596_v7, %v1597_v17  ;;  %v1375_v38 = vsel %vm1279_vm12, %v1117_v39, %v1327_v20  ;;  %v1241_v40 = vadd.f32 %v2277_v5, %v3121_v43  ;;  %v1245_v17 = vpop.f32.mrf.mxu0 }
 0x2e7   : > { %v1516_v55 = vrot.slane %v3210_v22, 2  ;;  %v1447_v42 = vrot.slane %v1446_v2, 4  ;;  %v1520_v46 = vmax.f32 %v1375_v38, %v1490_v28  ;;  %v1233_v47 = vadd.f32 %v1232_v31, %v3121_v43 }
 0x2e8   : > { %v1388_v49 = vsel %vm1292_vm13, %v1238_v0, %v1340_v26  ;;  %v1334_v36 = vmul.f32 0.01, %v1230_v29  ;;  %vm1295_vm0 = vcmp.ge.f32.partialorder %v1241_v40, 0.0  ;;  %v1343_v18 = vmul.f32 0.01, %v1241_v40 }
 0x2e9   : > { %v1592_v53 = vrot.slane %v1591_v27, 1  ;;  %vm1286_vm1 = vcmp.ge.f32.partialorder %v1230_v29, 0.0  ;;  %vm1289_vm2 = vcmp.ge.f32.partialorder %v1233_v47, 0.0  ;;  %v1337_v54 = vmul.f32 0.01, %v1233_v47 }
 0x2ea   : > { %v1599_v56 = vrot.slane %v1598_v35, 1  ;;  %v1125_v58 = vadd.f32 %v3163_v4, %v3112_v61  ;;  %v1391_v60 = vsel %vm1295_vm0, %v1241_v40, %v1343_v18  ;;  %v1129_v63 = vadd.f32 %v3181_v41, %v3112_v61  ;;  %v1140_v4 = vpop.f32.mrf.mxu1 }
 0x2eb   : > { %vm1639_vm4 = vcmask 1042434   ;;  %v1448_v51 = vmax.f32 %v1446_v2, %v1447_v42  ;;  %v1521_v6 = vrot.slane %v1520_v46, 4  ;;  %v1568_v8 = vsel %vm1556_vm5, %v1391_v60, -inf }
 0x2ec   : > { %v1385_v9 = vsel %vm1289_vm2, %v1233_v47, %v1337_v54  ;;  %vm1641_vm6 = vcmask 1043459   ;;  %v1382_v7 = vsel %vm1286_vm1, %v1230_v29, %v1334_v36  ;;  %v1608_v11 = vmax.f32 %v1388_v49, %v1568_v8  ;;  %v2281_v47 = vpop.f32.mrf.mxu0 }
 0x2ed   : > { %v1566_v39 = vsel %vm1556_vm5, %v1385_v9, -inf  ;;  %vm1287_vm7 = vcmp.ge.f32.partialorder %v1129_v63, 0.0  ;;  %v1593_v10 = vmax.f32 %v1591_v27, %v1592_v53  ;;  %v1335_v30 = vmul.f32 0.01, %v1129_v63 }
 0x2ee   : > { %v1601_v23 = vmax.f32 %v1382_v7, %v1566_v39  ;;  %v1131_v41 = vadd.f32 %v3192_v3, %v3114_v37  ;;  %vm1284_vm8 = vcmp.ge.f32.partialorder %v1125_v58, 0.0  ;;  %v1332_v14 = vmul.f32 0.01, %v1125_v58  ;;  %v3244_v3 = vpop.f32.mrf.mxu1 }
 0x2ef   : > { %v1609_v0 = vrot.slane %v1608_v11, 4  ;;  %v1127_v5 = vadd.f32 %v3171_v21, %v3114_v37  ;;  %v1522_v50 = vmax.f32 %v1520_v46, %v1521_v6  ;;  %v1383_v59 = vsel %vm1287_vm7, %v1129_v63, %v1335_v30  ;;  %v1248_v6 = vpop.f32.mrf.mxu0 }
 0x2f0   : > { %v1602_v15 = vrot.slane %v1601_v23, 4  ;;  %v1135_v16 = vadd.f32 %v3206_v13, %v3112_v61  ;;  %v1418_v20 = vsel %vm1408_vm15, %v1383_v59, -inf  ;;  %vm1288_vm9 = vcmp.ge.f32.partialorder %v1131_v41, 0.0  ;;  %v1146_v18 = vpop.f32.mrf.mxu1 }
 0x2f1   : > { %v1610_v19 = vmax.f32 %v1608_v11, %v1609_v0  ;;  %v1336_v2 = vmul.f32 0.01, %v1131_v41  ;;  %v1676_v24 = vsel %vm1637_vm14, %v3201_v12, %v3212_v48  ;;  %v1511_v21 = vrot.slane %v3220_v34, 1 }
 0x2f2   : > { %v1444_v26 = vrot.slane %v3222_v33, 1  ;;  %v1254_v28 = vadd.f32 %v2280_v44, %v3121_v43  ;;  %v3253_v13 = vmax.f32 %v3210_v22, %v1516_v55  ;;  %v1449_v29 = vrot.slane %v1448_v51, 2 }
 0x2f3   : > { %v1380_v31 = vsel %vm1284_vm8, %v1125_v58, %v1332_v14  ;;  %v1603_v27 = vmax.f32 %v1601_v23, %v1602_v15  ;;  %v1600_v38 = vmax.f32 %v1598_v35, %v1599_v56  ;;  %v1611_v40 = vrot.slane %v1610_v19, 2 }
 0x2f4   : > { %v1453_v42 = vmax.f32 %v1380_v31, %v1418_v20  ;;  %v1384_v46 = vsel %vm1288_vm9, %v1131_v41, %v1336_v2  ;;  %v1677_v12 = vsel %vm1639_vm4, %v1593_v10, %v1676_v24  ;;  %v1523_v48 = vrot.slane %v1522_v50, 2 }
 0x2f5   : > { %v1333_v49 = vmul.f32 0.01, %v1127_v5  ;;  %v1338_v36 = vmul.f32 0.01, %v1135_v16  ;;  %vm1285_vm10 = vcmp.ge.f32.partialorder %v1127_v5, 0.0  ;;  %vm1290_vm11 = vcmp.ge.f32.partialorder %v1135_v16, 0.0 }
 0x2f6   : > { %v1352_v53 = vmul.f32 0.01, %v1254_v28  ;;  %v1139_v22 = vadd.f32 %v1138_v52, %v3112_v61  ;;  %v3258_v55 = vmax.f32 %v1448_v51, %v1449_v29  ;;  %v1604_v54 = vrot.slane %v1603_v27, 2  ;;  %v1148_v51 = vpop.f32.mrf.mxu1 }
 0x2f7   : > { %v1492_v35 = vsel %vm1482_vm3, %v1384_v46, -inf  ;;  %vm1304_vm12 = vcmp.ge.f32.partialorder %v1254_v28, 0.0  ;;  %v1612_v56 = vmax.f32 %v1610_v19, %v1611_v40  ;;  %v3263_v58 = vsel %vm1641_vm6, %v1600_v38, %v1677_v12 }
 0x2f8   : > { %v1454_v60 = vrot.slane %v1453_v42, 4  ;;  %v1137_v63 = vadd.f32 %v3217_v32, %v3114_v37  ;;  %v3267_v8 = vmax.f32 %v1522_v50, %v1523_v48  ;;  %v1381_v9 = vsel %vm1285_vm10, %v1127_v5, %v1333_v49  ;;  %v1150_v59 = vpop.f32.mrf.mxu1 }
 0x2f9   : > { %v1386_v52 = vsel %vm1290_vm11, %v1135_v16, %v1338_v36  ;;  %vm1293_vm13 = vcmp.ge.f32.partialorder %v1139_v22, 0.0  ;;  %v1527_v44 = vmax.f32 %v1381_v9, %v1492_v35  ;;  %v1400_v7 = vsel %vm1304_vm12, %v1254_v28, %v1352_v53 }
 0x2fa   : > { %v1246_v11 = vadd.f32 %v1245_v17, %v3121_v43  ;;  %v1341_v39 = vmul.f32 0.01, %v1139_v22  ;;  %v1605_v10 = vmax.f32 %v1603_v27, %v1604_v54  ;;  %v1257_v23 = vadd.f32 %v2281_v47, %v3121_v43  ;;  %v1154_v40 = vpop.f32.mrf.mxu1 }
 0x2fb   : > { %v1141_v30 = vadd.f32 %v1140_v4, %v3114_v37  ;;  %v1249_v41 = vadd.f32 %v1248_v6, %v3121_v43  ;;  %v1613_v32 = vrot.slane %v1612_v56, 1  ;;  %v3273_v14 = vmax.f32 %v1453_v42, %v1454_v60 }
 0x2fc   : > { %v1339_v0 = vmul.f32 0.01, %v1137_v63  ;;  %v1389_v5 = vsel %vm1293_vm13, %v1139_v22, %v1341_v39  ;;  %vm1291_vm0 = vcmp.ge.f32.partialorder %v1137_v63, 0.0  ;;  %vm1307_vm1 = vcmp.ge.f32.partialorder %v1257_v23, 0.0  ;;  %v1156_v9 = vpop.f32.mrf.mxu1 }
 0x2fd   : > { %v1420_v50 = vsel %vm1408_vm15, %v1389_v5, -inf  ;;  %v1355_v15 = vmul.f32 0.01, %v1257_v23  ;;  %v1528_v16 = vrot.slane %v1527_v44, 4  ;;  %v1346_v17 = vmul.f32 0.01, %v1246_v11 }
 0x2fe   : > { %vm1294_vm2 = vcmp.ge.f32.partialorder %v1141_v30, 0.0  ;;  %v1342_v19 = vmul.f32 0.01, %v1141_v30  ;;  %vm1298_vm7 = vcmp.ge.f32.partialorder %v1246_v11, 0.0  ;;  %vm1301_vm8 = vcmp.ge.f32.partialorder %v1249_v41, 0.0 }
 0x2ff   : > { %v1403_v4 = vsel %vm1307_vm1, %v1257_v23, %v1355_v15  ;;  %v1349_v43 = vmul.f32 0.01, %v1249_v41  ;;  %v1387_v20 = vsel %vm1291_vm0, %v1137_v63, %v1339_v0  ;;  %v1460_v2 = vmax.f32 %v1386_v52, %v1420_v50  ;;  %v1158_v50 = vpop.f32.mrf.mxu1 }
 0x300   : > { %v1572_v24 = vsel %vm1556_vm5, %v1403_v4, -inf  ;;  %v1390_v28 = vsel %vm1294_vm2, %v1141_v30, %v1342_v19  ;;  %vm1643_vm9 = vcmask 1044484   ;;  %v1145_v38 = vadd.f32 %v3244_v3, %v3112_v61 }
 0x301   : > { %v1622_v29 = vmax.f32 %v1400_v7, %v1572_v24  ;;  %v1494_v31 = vsel %vm1482_vm3, %v1390_v28, -inf  ;;  %v1397_v27 = vsel %vm1301_vm8, %v1249_v41, %v1349_v43  ;;  %v1606_v42 = vrot.slane %v1605_v10, 1 }
 0x302   : > { %v1394_v46 = vsel %vm1298_vm7, %v1246_v11, %v1346_v17  ;;  %v1534_v47 = vmax.f32 %v1387_v20, %v1494_v31  ;;  %v1570_v12 = vsel %vm1556_vm5, %v1397_v27, -inf  ;;  %v1456_v48 = vrot.slane %v3273_v14, 2 }
 0x303   : > { %v1623_v49 = vrot.slane %v1622_v29, 4  ;;  %v1615_v36 = vmax.f32 %v1394_v46, %v1570_v12  ;;  %v1147_v53 = vadd.f32 %v1146_v18, %v3114_v37  ;;  %v3287_v22 = vmax.f32 %v1612_v56, %v1613_v32 }
 0x304   : > { %v1461_v54 = vrot.slane %v1460_v2, 4  ;;  %v1149_v35 = vadd.f32 %v1148_v51, %v3112_v61  ;;  %v1151_v3 = vadd.f32 %v1150_v59, %v3114_v37  ;;  %vm1296_vm10 = vcmp.ge.f32.partialorder %v1145_v38, 0.0 }
 0x305   : > { %v1624_v60 = vmax.f32 %v1622_v29, %v1623_v49  ;;  %v1616_v63 = vrot.slane %v1615_v36, 4  ;;  %v1344_v6 = vmul.f32 0.01, %v1145_v38  ;;  %v1535_v52 = vrot.slane %v1534_v47, 4 }
 0x306   : > { %vm1297_vm5 = vcmp.ge.f32.partialorder %v1147_v53, 0.0  ;;  %v1345_v7 = vmul.f32 0.01, %v1147_v53  ;;  %vm1299_vm11 = vcmp.ge.f32.partialorder %v1149_v35, 0.0  ;;  %v1347_v23 = vmul.f32 0.01, %v1149_v35 }
 0x307   : > { %v1625_v11 = vrot.slane %v1624_v60, 2  ;;  %v1617_v39 = vmax.f32 %v1615_v36, %v1616_v63  ;;  %vm1300_vm12 = vcmp.ge.f32.partialorder %v1151_v3, 0.0  ;;  %vm1645_vm13 = vcmask 1045509  }
 0x308   : > { %v1607_v18 = vmax.f32 %v1605_v10, %v1606_v42  ;;  %v1529_v56 = vmax.f32 %v1527_v44, %v1528_v16  ;;  %v1462_v30 = vmax.f32 %v1460_v2, %v1461_v54  ;;  %v1348_v51 = vmul.f32 0.01, %v1151_v3 }
 0x309   : > { %vm1647_vm0 = vcmask 1046534   ;;  %v1626_v41 = vmax.f32 %v1624_v60, %v1625_v11  ;;  %v1618_v32 = vrot.slane %v1617_v39, 2  ;;  %v1392_v0 = vsel %vm1296_vm10, %v1145_v38, %v1344_v6  ;;  %v1160_v38 = vpop.f32.mrf.mxu1 }
 0x30a   : > { %v1395_v5 = vsel %vm1299_vm11, %v1149_v35, %v1347_v23  ;;  %vm1649_vm1 = vcmask 1047559   ;;  %v1536_v15 = vmax.f32 %v1534_v47, %v1535_v52  ;;  %v1393_v59 = vsel %vm1297_vm5, %v1147_v53, %v1345_v7 }
 0x30b   : > { %v1422_v17 = vsel %vm1408_vm15, %v1395_v5, -inf  ;;  %v1396_v19 = vsel %vm1300_vm12, %v1151_v3, %v1348_v51  ;;  %v1619_v10 = vmax.f32 %v1617_v39, %v1618_v32  ;;  %v1155_v4 = vadd.f32 %v1154_v40, %v3112_v61 }
 0x30c   : > { %v1467_v44 = vmax.f32 %v1392_v0, %v1422_v17  ;;  %v1496_v16 = vsel %vm1482_vm3, %v1396_v19, -inf  ;;  %v1679_v43 = vsel %vm1643_vm9, %v1607_v18, %v3263_v58  ;;  %v3302_v20 = vmax.f32 %v3273_v14, %v1456_v48 }
 0x30d   : > { %v1530_v2 = vrot.slane %v1529_v56, 2  ;;  %v1541_v24 = vmax.f32 %v1393_v59, %v1496_v16  ;;  %v1627_v28 = vrot.slane %v1626_v41, 1  ;;  %v1620_v29 = vrot.slane %v1619_v10, 1 }
 0x30e   : > { %v1468_v31 = vrot.slane %v1467_v44, 4  ;;  %v1157_v27 = vadd.f32 %v1156_v9, %v3114_v37  ;;  %v1463_v42 = vrot.slane %v1462_v30, 2  ;;  %v1537_v46 = vrot.slane %v1536_v15, 2 }
 0x30f   : > { %v1542_v47 = vrot.slane %v1541_v24, 4  ;;  %v1159_v12 = vadd.f32 %v1158_v50, %v3112_v61  ;;  %v1621_v40 = vmax.f32 %v1619_v10, %v1620_v29  ;;  %vm1302_vm2 = vcmp.ge.f32.partialorder %v1155_v4, 0.0 }
 0x310   : > { %v1469_v49 = vmax.f32 %v1467_v44, %v1468_v31  ;;  %v1350_v58 = vmul.f32 0.01, %v1155_v4  ;;  %v1161_v48 = vadd.f32 %v1160_v38, %v3114_v37  ;;  %v1628_v53 = vmax.f32 %v1626_v41, %v1627_v28 }
 0x311   : > { %v1543_v36 = vmax.f32 %v1541_v24, %v1542_v47  ;;  %vm1305_vm7 = vcmp.ge.f32.partialorder %v1159_v12, 0.0  ;;  %v1353_v14 = vmul.f32 0.01, %v1159_v12  ;;  %vm1303_vm8 = vcmp.ge.f32.partialorder %v1157_v27, 0.0 }
 0x312   : > { %v1470_v54 = vrot.slane %v1469_v49, 2  ;;  %v1351_v35 = vmul.f32 0.01, %v1157_v27  ;;  %vm1306_vm10 = vcmp.ge.f32.partialorder %v1161_v48, 0.0  ;;  %v1354_v60 = vmul.f32 0.01, %v1161_v48 }
 0x313   : > { %v1401_v3 = vsel %vm1305_vm7, %v1159_v12, %v1353_v14  ;;  %v1680_v63 = vsel %vm1645_vm13, %v3287_v22, %v1679_v43  ;;  %v1544_v61 = vrot.slane %v1543_v36, 2  ;;  %v1398_v6 = vsel %vm1302_vm2, %v1155_v4, %v1350_v58 }
 0x314   : > { %v1424_v9 = vsel %vm1408_vm15, %v1401_v3, -inf  ;;  %v1681_v52 = vsel %vm1647_vm0, %v1621_v40, %v1680_v63  ;;  %v1531_v7 = vmax.f32 %v1529_v56, %v1530_v2  ;;  %v1402_v37 = vsel %vm1306_vm10, %v1161_v48, %v1354_v60 }
 0x315   : > { %v1474_v11 = vmax.f32 %v1398_v6, %v1424_v9  ;;  %v1682_v39 = vsel %vm1649_vm1, %v1628_v53, %v1681_v52  ;;  %v1464_v23 = vmax.f32 %v1462_v30, %v1463_v42  ;;  %v1399_v18 = vsel %vm1303_vm8, %v1157_v27, %v1351_v35 }
 0x316   : > { %v1498_v51 = vsel %vm1482_vm3, %v1402_v37, -inf  ;;  %v1686_v41 = vpack.c.bf16 %v1682_v39, %v1682_v39  ;;  %v1538_v32 = vmax.f32 %v1536_v15, %v1537_v46  ;;  %v1471_v22 = vmax.f32 %v1469_v49, %v1470_v54 }
 0x317   : > { %v1475_v0 = vrot.slane %v1474_v11, 4  ;;  %v1548_v5 = vmax.f32 %v1399_v18, %v1498_v51  ;;  %v1438_v50 = vmax.f32 %v3208_v62, %v1437_v1  ;;  %v1518_v56 = vrot.slane %v3253_v13, 1 }
 0x318   : > { %v1451_v59 = vrot.slane %v3258_v55, 1  ;;  %v1545_v17 = vmax.f32 %v1543_v36, %v1544_v61  ;;  %2299 = vmatmul.mubr.bf16.vlgmr.msra.gmra.mxu1 %v1686_v41  ;;  %v1525_v30 = vrot.slane %v3267_v8, 1  ;;  %v1458_v25 = vrot.slane %v3302_v20, 1 }
 0x319   : > { %v1476_v19 = vmax.f32 %v1474_v11, %v1475_v0  ;;  %v1549_v10 = vrot.slane %v1548_v5, 4  ;;  %v1512_v15 = vmax.f32 %v3220_v34, %v1511_v21  ;;  %v1445_v62 = vmax.f32 %v3222_v33, %v1444_v26 }
 0x31a   : > { %v1532_v1 = vrot.slane %v1531_v7, 1  ;;  %v1465_v44 = vrot.slane %v1464_v23, 1  ;;  %v1539_v16 = vrot.slane %v1538_v32, 1  ;;  %v1472_v4 = vrot.slane %v1471_v22, 1 }
 0x31b   : > { %v1477_v43 = vrot.slane %v1476_v19, 2  ;;  %v1550_v2 = vmax.f32 %v1548_v5, %v1549_v10  ;;  %v1638_v24 = vsel %vm1637_vm14, %v1438_v50, %v3190_v57  ;;  %v1519_v28 = vmax.f32 %v3253_v13, %v1518_v56 }
 0x31c   : > { %v1452_v29 = vmax.f32 %v3258_v55, %v1451_v59  ;;  %v1546_v31 = vrot.slane %v1545_v17, 1  ;;  %v1526_v34 = vmax.f32 %v3267_v8, %v1525_v30  ;;  %v1459_v21 = vmax.f32 %v3302_v20, %v1458_v25 }
 0x31d   : > { %v1478_v27 = vmax.f32 %v1476_v19, %v1477_v43  ;;  %v1551_v33 = vrot.slane %v1550_v2, 2  ;;  %v1660_v26 = vsel %vm1637_vm14, %v1512_v15, %v3199_v45  ;;  %v1640_v38 = vsel %vm1639_vm4, %v1445_v62, %v1638_v24 }
 0x31e   : > { %v1533_v42 = vmax.f32 %v1531_v7, %v1532_v1  ;;  %v1466_v46 = vmax.f32 %v1464_v23, %v1465_v44  ;;  %v1540_v47 = vmax.f32 %v1538_v32, %v1539_v16  ;;  %v1473_v57 = vmax.f32 %v1471_v22, %v1472_v4  ;;  %v2150_v23 = vld [vmem:[%s3390_s5] ss:$0 sm:$0xff] }
 0x31f   : > { %v1479_v12 = vrot.slane %v1478_v27, 1  ;;  %v1552_v13 = vmax.f32 %v1550_v2, %v1551_v33  ;;  %v1642_v55 = vsel %vm1641_vm6, %v1452_v29, %v1640_v38  ;;  %v1547_v40 = vmax.f32 %v1545_v17, %v1546_v31 }
 0x320   : > { %v1661_v8 = vsel %vm1639_vm4, %v1519_v28, %v1660_v26  ;;  %v1644_v20 = vsel %vm1643_vm9, %v1459_v21, %v1642_v55 }
 0x321   : > { %v1480_v49 = vmax.f32 %v1478_v27, %v1479_v12  ;;  %v1553_v58 = vrot.slane %v1552_v13, 1  ;;  %v1662_v36 = vsel %vm1641_vm6, %v1526_v34, %v1661_v8  ;;  %v1646_v14 = vsel %vm1645_vm13, %v1466_v46, %v1644_v20 }
 0x322   : > { %v1663_v45 = vsel %vm1643_vm9, %v1533_v42, %v1662_v36  ;;  %v1648_v54 = vsel %vm1647_vm0, %v1473_v57, %v1646_v14 }
 0x323   : > { %v1554_v48 = vmax.f32 %v1552_v13, %v1553_v58  ;;  %v1664_v53 = vsel %vm1645_vm13, %v1540_v47, %v1663_v45  ;;  %v1650_v3 = vsel %vm1649_vm1, %v1480_v49, %v1648_v54 }
 0x324   : > { %v1665_v35 = vsel %vm1647_vm0, %v1547_v40, %v1664_v53  ;;  %v1684_v61 = vpack.c.bf16 %v1650_v3, %v1650_v3 }
 0x325   : > { %v1666_v60 = vsel %vm1649_vm1, %v1554_v48, %v1665_v35 }
 0x326   : > { %v1685_v63 = vpack.c.bf16 %v1666_v60, %v1666_v60 }
 0x328   : > { %1912 = vmatprep.mubr.bf16.mxu0 %v1685_v63 }
 0x329   : > { %1913 = vmatmul.mubr.bf16.vlgmr.msra.gmra.mxu0 %v1684_v61 }
 0x3d8   : > { %v1954_v6 = vpop.f32.mrf.mxu1 }
 0x3da   : > { %v2300_v9 = vpop.f32.mrf.mxu1 }
 0x3dc   : > { %v1957_v52 = vpop.f32.mrf.mxu1 }
 0x3de   : > { %v2301_v7 = vpop.f32.mrf.mxu1 }
 0x3e9   : > { %v2203_v11 = vpop.f32.mrf.mxu0 }
 0x3eb   : > { %v2204_v37 = vpop.f32.mrf.mxu0 }
 0x3ec   : > { %v2205_v39 = vadd.f32 %v2204_v37, %v2203_v11 }
 0x3ed   : > { %v2206_v18 = vpop.f32.mrf.mxu0 }
 0x3ee   : > { %v1955_v51 = vadd.f32 %v2205_v39, %v1954_v6 }
 0x3ef   : > { %v2207_v41 = vpop.f32.mrf.mxu0 }
 0x3f0   : > { %v1966_v32 = vadd.f32 %v2150_v23, %v1955_v51 }
 0x3f2   : > { %1967 = vst [vmem:[%s260_s28] sm:$0xff] %v1966_v32 }
 0x3f3   : > { %2586 = shalt.err (!%p2583_p0)
}
 0x3f4   : > { %s2587_s15 = scalar_lea.hbm %s1980_s10, 128  ;;  %s2591_s18 = scalar_lea.hbm %s3391_s6, 256 }
 0x3f5   : > { %p2588_p1 = scmp.ne.s32.totalorder %s1980_s10, %s2587_s15  ;;  %p2592_p4 = scmp.lt.s32.totalorder %s1980_s10, %s3391_s6 }
 0x3f6   : > { %p2593_p7 = scmp.lt.s32.totalorder %s2591_s18, %s2587_s15 }
 0x3f7   : > { %p2589_p2 = pnand %p2588_p1, %p2723_p5 }
 0x3f8   : > { %p2594_p6 = por %p2593_p7, %p2592_p4 }
 0x3f9   : > { %p2590_p3 = pneg %p2589_p2 }
 0x3fb   : > { %p2595_p8 = pnand %p2594_p6, %p2590_p3 }
 0x3fd   : > { %2598 = shalt.err (!%p2595_p8)
}
 0x3fe   : > { %2306 = dma.vmem_to_hbm [thread:$0]  (%p2723_p5), %s1983_s29, 128, %s1980_s10, %s1969_s11  }
 0x3ff PF: > { %p2318_p9 = scmp.ge.s32.totalorder %s2637_s24, 2  ;;  %s1994_s28 = sand.u32 1, %s2625_s21  }
 0x400   : > { %p3395_p10 = scmp.ne.s32.totalorder %s3393_s8, 0  ;;  %s1995_s26 = scalar_lea.sflag [#allocation4], %s1994_s28 }
 0x402   : > { %p2313_p11 = pnand %p2318_p9, %p3395_p10 }
 0x404   : > { %p2314_p12 = pneg %p2313_p11 }
 0x406   : > { %2620 = dma.done.wait (%p2314_p12), %s1995_s26, 128  }
 0x407   : > { %2622 = vsyncadd (%p2314_p12), %s1995_s26, 4294967168  ;;  %p17_p13 = scmp.ge.s32.totalorder %s2710_s27, 4   ;;  %s3396_s21 = smov %s2629_s22 }
 0x408   : > { %s3397_s22 = smov %s2633_s23  ;;  %s3398_s23 = smov %s2721_s30 }
 0x409   : > { %s3399_s24 = smov %s2710_s27  ;;  %19 = sbr.rel (!%p17_p13) target bundleno = 4 (0x4), region = 84 }
 0x40e   :  { %2000 = vsyncpa [#allocation3], 1 }
 0x40f   :  { %2002 = vsyncpa [#allocation3 + $0x1], 1 }
 0x410   :  { %2003 = vsyncpa [#allocation4], 1 }
 0x411   :  { %2005 = vsyncpa [#allocation4 + $0x1], 1 }

</bundles_post_ra>
